<compile_context>
chip_gen: v7x
topology: tpu7x:2x2x1
jax: 0.10.0
libtpu: 0.0.40
codegen_flags: <defaults>
</compile_context>

<pallas_src>
import functools

import jax
import jax.numpy as jnp
from jax.experimental import pallas as pl
from jax.experimental.pallas import tpu as pltpu

# Model hyper-parameters (small, consistent with the module's hidden-state shapes).
D = 32          # hidden width
H = 4           # attention heads
DH = D // H     # per-head width
FF = 64         # MLP inner width
EPS = 1e-5


# ----------------------------- in-kernel math helpers -----------------------------

def _layernorm(x, g, b):
    # f32 throughout (VPU work; keeping it f32 avoids bf16 converts on v5e).
    mu = jnp.mean(x, axis=-1, keepdims=True)
    var = jnp.mean((x - mu) ** 2, axis=-1, keepdims=True)
    return (x - mu) * jax.lax.rsqrt(var + EPS) * g + b


def _mha(q_in, kv_in, wqkv_ref, wo_h):
    """Head-batched multi-head attention with no in-kernel slices/stacks/transposes.

    q_in:  (Sq, D)  f32 activations (queries)
    kv_in: (Skv, D) f32 activations (keys/values source)
    wqkv_ref: VMEM ref (3, H, D, DH) bf16 — per-head Q/K/V projection weights
              (1/sqrt(DH) already folded into the Q slab by prepare_params).
    wo_h:  (H, DH, D) bf16 — per-head output projection weights.
    Returns (Sq, D) f32.
    """
    sq, skv = q_in.shape[0], kv_in.shape[0]
    qb = jnp.broadcast_to(q_in.astype(jnp.bfloat16), (H, sq, D))
    kvb = jnp.broadcast_to(kv_in.astype(jnp.bfloat16), (H, skv, D))

    # Per-head projections: canonical batched matmuls (batch = head), bf16 in / f32 acc.
    qh = jnp.einsum('hsd,hde->hse', qb, wqkv_ref[0], preferred_element_type=jnp.float32)
    kh = jnp.einsum('hsd,hde->hse', kvb, wqkv_ref[1], preferred_element_type=jnp.float32)
    vh = jnp.einsum('hsd,hde->hse', kvb, wqkv_ref[2], preferred_element_type=jnp.float32)

    # Scores + softmax (f32 math, one approx reciprocal per row on the EUP).
    s = jnp.einsum('hqe,hke->hqk', qh.astype(jnp.bfloat16), kh.astype(jnp.bfloat16),
                   preferred_element_type=jnp.float32)
    s = s - jnp.max(s, axis=-1, keepdims=True)
    e = jnp.exp(s)
    inv = pl.reciprocal(jnp.sum(e, axis=-1, keepdims=True), approx=True)
    p = (e * inv).astype(jnp.bfloat16)

    # Value contraction and per-head output projection; head merge is a free axis-0 sum.
    o = jnp.einsum('hqk,hke->hqe', p, vh.astype(jnp.bfloat16),
                   preferred_element_type=jnp.float32)
    oo = jnp.einsum('hqe,hed->hqd', o.astype(jnp.bfloat16), wo_h,
                    preferred_element_type=jnp.float32)
    return jnp.sum(oo, axis=0)                       # (Sq, D) f32


# --------------------------------- Pallas kernel -----------------------------------

def _decoder_kernel(x_ref, ctx_ref,
                    wqkv1_ref, wo1_ref,          # self-attention ("refl")
                    wqkv2_ref, wo2_ref,          # cross-attention ("attn")
                    wi_ref, wo3_ref,             # feed-forward ("ffnet")
                    vec_ref,                     # packed gains / biases (8, FF) f32
                    o_ref):
    x = x_ref[...]        # (S, D) f32 — one batch element per grid step
    ctx = ctx_ref[...]    # (T, D) f32

    g1, b1 = vec_ref[0:1, :D], vec_ref[1:2, :D]
    g2, b2 = vec_ref[2:3, :D], vec_ref[3:4, :D]
    g3, b3 = vec_ref[4:5, :D], vec_ref[5:6, :D]
    bo3 = vec_ref[6:7, :D]
    bi = vec_ref[7:8, :]

    # 1) reflect(x): self-attention, residual + LN.
    y = _layernorm(x + _mha(x, x, wqkv1_ref, wo1_ref[...]), g1, b1)

    # 2) attn([y, ctx]): cross-attention, residual + LN.
    z = _layernorm(y + _mha(y, ctx, wqkv2_ref, wo2_ref[...]), g2, b2)

    # 3) ffnet: 2-layer ReLU MLP (bf16 matmuls, f32 accumulate/bias), residual + LN.
    hmid = jnp.maximum(
        jnp.dot(z.astype(jnp.bfloat16), wi_ref[...],
                preferred_element_type=jnp.float32) + bi, 0.0)
    f = jnp.dot(hmid.astype(jnp.bfloat16), wo3_ref[...],
                preferred_element_type=jnp.float32) + bo3
    out = _layernorm(z + f, g3, b3)

    o_ref[...] = out.astype(o_ref.dtype)   # single contiguous (S, D) store


# --------------------------------- wrapper -----------------------------------------

def prepare_params(p):
    """One-time parameter prep (hoisted off the forward path):
    fold 1/sqrt(DH) into Q, arrange per-head weight slabs, cast matmul weights to bf16,
    pack all gain/bias vectors into one (8, FF) f32 slab."""
    scale = 1.0 / (DH ** 0.5)

    def heads_in(w):    # (D, D) -> (H, D, DH): per-head input-projection slab
        return w.reshape(D, H, DH).transpose(1, 0, 2)

    def heads_out(w):   # (D, D) -> (H, DH, D): per-head output-projection slab
        return w.reshape(H, DH, D)

    wqkv1_h = jnp.stack([heads_in(p["wq1"] * scale), heads_in(p["wk1"]),
                         heads_in(p["wv1"])]).astype(jnp.bfloat16)          # (3,H,D,DH)
    wqkv2_h = jnp.stack([heads_in(p["wq2"] * scale), heads_in(p["wk2"]),
                         heads_in(p["wv2"])]).astype(jnp.bfloat16)          # (3,H,D,DH)
    wo1_h = heads_out(p["wo1"]).astype(jnp.bfloat16)                        # (H,DH,D)
    wo2_h = heads_out(p["wo2"]).astype(jnp.bfloat16)                        # (H,DH,D)

    pad = lambda v: jnp.pad(v, ((0, 0), (0, FF - v.shape[1])))
    vec = jnp.concatenate(
        [pad(p["g1"]), pad(p["b1"]),
         pad(p["g2"]), pad(p["b2"]),
         pad(p["g3"]), pad(p["b3"]),
         pad(p["bo3"]), pad(p["bi"])], axis=0).astype(jnp.float32)          # (8, FF)

    return {"wqkv1_h": wqkv1_h, "wo1_h": wo1_h,
            "wqkv2_h": wqkv2_h, "wo2_h": wo2_h,
            "wi": p["wi"].astype(jnp.bfloat16),
            "wo3": p["wo3"].astype(jnp.bfloat16),
            "vec": vec}


def decoder_forward(x, ctx, prepped):
    B, S, _ = x.shape
    T = ctx.shape[1]

    out = pl.pallas_call(
        _decoder_kernel,
        out_shape=jax.ShapeDtypeStruct((B * S, D), x.dtype),
        grid=(B,),
        in_specs=[
            pl.BlockSpec((S, D), lambda b: (b, 0)),                 # x (per batch)
            pl.BlockSpec((T, D), lambda b: (b, 0)),                 # ctx (per batch)
            pl.BlockSpec((3, H, D, DH), lambda b: (0, 0, 0, 0)),    # wqkv1 (resident)
            pl.BlockSpec((H, DH, D), lambda b: (0, 0, 0)),          # wo1   (resident)
            pl.BlockSpec((3, H, D, DH), lambda b: (0, 0, 0, 0)),    # wqkv2 (resident)
            pl.BlockSpec((H, DH, D), lambda b: (0, 0, 0)),          # wo2   (resident)
            pl.BlockSpec((D, FF), lambda b: (0, 0)),                # wi    (resident)
            pl.BlockSpec((FF, D), lambda b: (0, 0)),                # wo3   (resident)
            pl.BlockSpec((8, FF), lambda b: (0, 0)),                # packed vecs
        ],
        out_specs=pl.BlockSpec((S, D), lambda b: (b, 0)),
        compiler_params=pltpu.CompilerParams(
            dimension_semantics=("parallel",)),      # shards batches across v7x's 2 TCs
    )(x.reshape(B * S, D), ctx.reshape(B * T, D),
      prepped["wqkv1_h"], prepped["wo1_h"],
      prepped["wqkv2_h"], prepped["wo2_h"],
      prepped["wi"], prepped["wo3"], prepped["vec"])
    return out.reshape(B, S, D)


# ---------------------------- deterministic params ---------------------------------

def init_params(key):
    ks = jax.random.split(key, 12)
    p = {}
    # self-attention
    p["wq1"] = 0.02 * jax.random.normal(ks[0], (D, D), jnp.float32)
    p["wk1"] = 0.02 * jax.random.normal(ks[1], (D, D), jnp.float32)
    p["wv1"] = 0.02 * jax.random.normal(ks[2], (D, D), jnp.float32)
    p["wo1"] = 0.02 * jax.random.normal(ks[3], (D, D), jnp.float32)
    p["g1"] = jnp.ones((1, D), jnp.float32)
    p["b1"] = jnp.zeros((1, D), jnp.float32)
    # cross-attention
    p["wq2"] = 0.02 * jax.random.normal(ks[4], (D, D), jnp.float32)
    p["wk2"] = 0.02 * jax.random.normal(ks[5], (D, D), jnp.float32)
    p["wv2"] = 0.02 * jax.random.normal(ks[6], (D, D), jnp.float32)
    p["wo2"] = 0.02 * jax.random.normal(ks[7], (D, D), jnp.float32)
    p["g2"] = jnp.ones((1, D), jnp.float32)
    p["b2"] = jnp.zeros((1, D), jnp.float32)
    # feed-forward
    p["wi"] = 0.02 * jax.random.normal(ks[8], (D, FF), jnp.float32)
    p["bi"] = jnp.zeros((1, FF), jnp.float32)
    p["wo3"] = 0.02 * jax.random.normal(ks[9], (FF, D), jnp.float32)
    p["bo3"] = jnp.zeros((1, D), jnp.float32)
    p["g3"] = jnp.ones((1, D), jnp.float32)
    p["b3"] = jnp.zeros((1, D), jnp.float32)
    return p


# --------------------------------- reference ----------------------------------------

def decoder_reference(x, ctx, p):
    def mha(q_in, kv_in, wq, wk, wv, wo):
        q = q_in @ wq
        k = kv_in @ wk
        v = kv_in @ wv
        B, S, _ = q.shape
        L = k.shape[1]
        qh = q.reshape(B, S, H, DH).transpose(0, 2, 1, 3)
        kh = k.reshape(B, L, H, DH).transpose(0, 2, 1, 3)
        vh = v.reshape(B, L, H, DH).transpose(0, 2, 1, 3)
        s = jnp.einsum("bhqd,bhkd->bhqk", qh, kh) / (DH ** 0.5)
        pmat = jax.nn.softmax(s, axis=-1)
        o = jnp.einsum("bhqk,bhkd->bhqd", pmat, vh).transpose(0, 2, 1, 3).reshape(B, S, D)
        return o @ wo

    def ln(v, g, b):
        mu = jnp.mean(v, axis=-1, keepdims=True)
        var = jnp.mean((v - mu) ** 2, axis=-1, keepdims=True)
        return (v - mu) * jax.lax.rsqrt(var + EPS) * g + b

    y = ln(x + mha(x, x, p["wq1"], p["wk1"], p["wv1"], p["wo1"]), p["g1"], p["b1"])
    z = ln(y + mha(y, ctx, p["wq2"], p["wk2"], p["wv2"], p["wo2"]), p["g2"], p["b2"])
    f = jnp.maximum(z @ p["wi"] + p["bi"], 0.0) @ p["wo3"] + p["bo3"]
    return ln(z + f, p["g3"], p["b3"])


# ----------------------------------- main --------------------------------------------

if __name__ == "__main__":
    key = jax.random.PRNGKey(0)
    kx, kc, kp = jax.random.split(key, 3)

    B, S, T = 2, 8, 8
    x = jax.random.normal(kx, (B, S, D), jnp.float32)
    ctx = jax.random.normal(kc, (B, T, D), jnp.float32)
    params = init_params(kp)
    prepped = prepare_params(params)       # one-time weight fusion / bf16 cast

    y = decoder_forward(x, ctx, prepped)
    y = jax.block_until_ready(y)

    y_ref = decoder_reference(x, ctx, params)
    assert y.shape == (B, S, D)
    # Tolerance sized for bf16 matmul operands (f32 accumulation) + approx reciprocal;
    # the f32 reference and the kernel agree to ~1e-2 at these scales.
    max_err = float(jnp.max(jnp.abs(y - y_ref)))
    assert jnp.allclose(y, y_ref, atol=3e-2, rtol=3e-2), f"mismatch vs reference: {max_err}"

    print("KERNEL_OK")
</pallas_src>

<mosaic_0001>
module attributes {stable_mosaic.version = 11 : i64} {
  func.func @_decoder_kernel(%arg0: i32, %arg1: memref<8x32xf32, #tpu.memory_space<vmem>>, %arg2: memref<8x32xf32, #tpu.memory_space<vmem>>, %arg3: memref<3x4x32x8xbf16, #tpu.memory_space<vmem>>, %arg4: memref<4x8x32xbf16, #tpu.memory_space<vmem>>, %arg5: memref<3x4x32x8xbf16, #tpu.memory_space<vmem>>, %arg6: memref<4x8x32xbf16, #tpu.memory_space<vmem>>, %arg7: memref<32x64xbf16, #tpu.memory_space<vmem>>, %arg8: memref<64x32xbf16, #tpu.memory_space<vmem>>, %arg9: memref<8x64xf32, #tpu.memory_space<vmem>>, %arg10: memref<8x32xf32, #tpu.memory_space<vmem>>) attributes {dimension_semantics = [#tpu.dimension_semantics<parallel>], iteration_bounds = array<i64: 2>, scalar_prefetch = 0 : i64, scratch_operands = 0 : i64, tpu.core_type = #tpu.core_type<tc>, window_params = [{transform_indices = @transform_0, window_bounds = array<i64: 8, 32>}, {transform_indices = @transform_1, window_bounds = array<i64: 8, 32>}, {pipeline_mode = #tpu.pipeline_mode<synchronous>, transform_indices = @transform_2, window_bounds = array<i64: 3, 4, 32, 8>}, {pipeline_mode = #tpu.pipeline_mode<synchronous>, transform_indices = @transform_3, window_bounds = array<i64: 4, 8, 32>}, {pipeline_mode = #tpu.pipeline_mode<synchronous>, transform_indices = @transform_4, window_bounds = array<i64: 3, 4, 32, 8>}, {pipeline_mode = #tpu.pipeline_mode<synchronous>, transform_indices = @transform_5, window_bounds = array<i64: 4, 8, 32>}, {pipeline_mode = #tpu.pipeline_mode<synchronous>, transform_indices = @transform_6, window_bounds = array<i64: 32, 64>}, {pipeline_mode = #tpu.pipeline_mode<synchronous>, transform_indices = @transform_7, window_bounds = array<i64: 64, 32>}, {pipeline_mode = #tpu.pipeline_mode<synchronous>, transform_indices = @transform_8, window_bounds = array<i64: 8, 64>}, {transform_indices = @transform_9, window_bounds = array<i64: 8, 32>}]} {
    %c0 = arith.constant 0 : index
    %c0_0 = arith.constant 0 : index
    %0 = vector.load %arg1[%c0, %c0_0] : memref<8x32xf32, #tpu.memory_space<vmem>>, vector<8x32xf32>
    %c0_1 = arith.constant 0 : index
    %c0_2 = arith.constant 0 : index
    %1 = vector.load %arg2[%c0_1, %c0_2] : memref<8x32xf32, #tpu.memory_space<vmem>>, vector<8x32xf32>
    %c0_3 = arith.constant 0 : index
    %c0_4 = arith.constant 0 : index
    %2 = vector.load %arg9[%c0_3, %c0_4] : memref<8x64xf32, #tpu.memory_space<vmem>>, vector<1x32xf32>
    %c1 = arith.constant 1 : index
    %c0_5 = arith.constant 0 : index
    %3 = vector.load %arg9[%c1, %c0_5] : memref<8x64xf32, #tpu.memory_space<vmem>>, vector<1x32xf32>
    %c2 = arith.constant 2 : index
    %c0_6 = arith.constant 0 : index
    %4 = vector.load %arg9[%c2, %c0_6] : memref<8x64xf32, #tpu.memory_space<vmem>>, vector<1x32xf32>
    %c3 = arith.constant 3 : index
    %c0_7 = arith.constant 0 : index
    %5 = vector.load %arg9[%c3, %c0_7] : memref<8x64xf32, #tpu.memory_space<vmem>>, vector<1x32xf32>
    %c4 = arith.constant 4 : index
    %c0_8 = arith.constant 0 : index
    %6 = vector.load %arg9[%c4, %c0_8] : memref<8x64xf32, #tpu.memory_space<vmem>>, vector<1x32xf32>
    %c5 = arith.constant 5 : index
    %c0_9 = arith.constant 0 : index
    %7 = vector.load %arg9[%c5, %c0_9] : memref<8x64xf32, #tpu.memory_space<vmem>>, vector<1x32xf32>
    %c6 = arith.constant 6 : index
    %c0_10 = arith.constant 0 : index
    %8 = vector.load %arg9[%c6, %c0_10] : memref<8x64xf32, #tpu.memory_space<vmem>>, vector<1x32xf32>
    %c7 = arith.constant 7 : index
    %c0_11 = arith.constant 0 : index
    %9 = vector.load %arg9[%c7, %c0_11] : memref<8x64xf32, #tpu.memory_space<vmem>>, vector<1x64xf32>
    %c0_12 = arith.constant 0 : index
    %c0_13 = arith.constant 0 : index
    %c0_14 = arith.constant 0 : index
    %10 = vector.load %arg4[%c0_12, %c0_13, %c0_14] : memref<4x8x32xbf16, #tpu.memory_space<vmem>>, vector<4x8x32xbf16>
    %11 = arith.truncf %0 : vector<8x32xf32> to vector<8x32xbf16>
    %12 = vector.shape_cast %11 : vector<8x32xbf16> to vector<1x8x32xbf16>
    %13 = vector.broadcast %12 : vector<1x8x32xbf16> to vector<4x8x32xbf16>
    %14 = arith.truncf %0 : vector<8x32xf32> to vector<8x32xbf16>
    %15 = vector.shape_cast %14 : vector<8x32xbf16> to vector<1x8x32xbf16>
    %16 = vector.broadcast %15 : vector<1x8x32xbf16> to vector<4x8x32xbf16>
    %c0_15 = arith.constant 0 : index
    %c0_16 = arith.constant 0 : index
    %c0_17 = arith.constant 0 : index
    %c0_18 = arith.constant 0 : index
    %17 = vector.load %arg3[%c0_15, %c0_16, %c0_17, %c0_18] : memref<3x4x32x8xbf16, #tpu.memory_space<vmem>>, vector<1x4x32x8xbf16>
    %18 = vector.shape_cast %17 : vector<1x4x32x8xbf16> to vector<4x32x8xbf16>
    "tpu.trace_start"() <{level = 10 : i32, message = "hsd,hde->hse"}> : () -> ()
    %cst = arith.constant dense<0.000000e+00> : vector<4x8x8xf32>
    %19 = tpu.matmul %13, %18, %cst {dimension_numbers = #tpu.dot_dimension_numbers<[2], [1], [1], [2], [0, 0, 0, 1, 1, 2], [0], [0]>} : vector<4x8x32xbf16>, vector<4x32x8xbf16>, vector<4x8x8xf32> -> vector<4x8x8xf32>
    "tpu.trace_stop"() : () -> ()
    %c1_19 = arith.constant 1 : index
    %c0_20 = arith.constant 0 : index
    %c0_21 = arith.constant 0 : index
    %c0_22 = arith.constant 0 : index
    %20 = vector.load %arg3[%c1_19, %c0_20, %c0_21, %c0_22] : memref<3x4x32x8xbf16, #tpu.memory_space<vmem>>, vector<1x4x32x8xbf16>
    %21 = vector.shape_cast %20 : vector<1x4x32x8xbf16> to vector<4x32x8xbf16>
    "tpu.trace_start"() <{level = 10 : i32, message = "hsd,hde->hse"}> : () -> ()
    %cst_23 = arith.constant dense<0.000000e+00> : vector<4x8x8xf32>
    %22 = tpu.matmul %16, %21, %cst_23 {dimension_numbers = #tpu.dot_dimension_numbers<[2], [1], [1], [2], [0, 0, 0, 1, 1, 2], [0], [0]>} : vector<4x8x32xbf16>, vector<4x32x8xbf16>, vector<4x8x8xf32> -> vector<4x8x8xf32>
    "tpu.trace_stop"() : () -> ()
    %c2_24 = arith.constant 2 : index
    %c0_25 = arith.constant 0 : index
    %c0_26 = arith.constant 0 : index
    %c0_27 = arith.constant 0 : index
    %23 = vector.load %arg3[%c2_24, %c0_25, %c0_26, %c0_27] : memref<3x4x32x8xbf16, #tpu.memory_space<vmem>>, vector<1x4x32x8xbf16>
    %24 = vector.shape_cast %23 : vector<1x4x32x8xbf16> to vector<4x32x8xbf16>
    "tpu.trace_start"() <{level = 10 : i32, message = "hsd,hde->hse"}> : () -> ()
    %cst_28 = arith.constant dense<0.000000e+00> : vector<4x8x8xf32>
    %25 = tpu.matmul %16, %24, %cst_28 {dimension_numbers = #tpu.dot_dimension_numbers<[2], [1], [1], [2], [0, 0, 0, 1, 1, 2], [0], [0]>} : vector<4x8x32xbf16>, vector<4x32x8xbf16>, vector<4x8x8xf32> -> vector<4x8x8xf32>
    "tpu.trace_stop"() : () -> ()
    %26 = arith.truncf %19 : vector<4x8x8xf32> to vector<4x8x8xbf16>
    %27 = arith.truncf %22 : vector<4x8x8xf32> to vector<4x8x8xbf16>
    "tpu.trace_start"() <{level = 10 : i32, message = "hqe,hke->hqk"}> : () -> ()
    %cst_29 = arith.constant dense<0.000000e+00> : vector<4x8x8xf32>
    %28 = tpu.matmul %26, %27, %cst_29 {dimension_numbers = #tpu.dot_dimension_numbers<[2], [2], [1], [1], [0, 0, 0, 1, 1, 1], [0], [0]>} : vector<4x8x8xbf16>, vector<4x8x8xbf16>, vector<4x8x8xf32> -> vector<4x8x8xf32>
    "tpu.trace_stop"() : () -> ()
    %cst_30 = arith.constant dense<0xFF800000> : vector<4x8xf32>
    %29 = vector.multi_reduction <maximumf>, %28, %cst_30 [2] : vector<4x8x8xf32> to vector<4x8xf32>
    %30 = vector.shape_cast %29 : vector<4x8xf32> to vector<4x8x1xf32>
    %31 = vector.broadcast %30 : vector<4x8x1xf32> to vector<4x8x8xf32>
    %32 = arith.subf %28, %31 : vector<4x8x8xf32>
    %33 = math.exp %32 : vector<4x8x8xf32>
    %cst_31 = arith.constant dense<0.000000e+00> : vector<4x8xf32>
    %34 = vector.multi_reduction <add>, %33, %cst_31 [2] : vector<4x8x8xf32> to vector<4x8xf32>
    %35 = vector.shape_cast %34 : vector<4x8xf32> to vector<4x8x1xf32>
    %36 = tpu.reciprocal %35 {approx = true} : vector<4x8x1xf32> -> vector<4x8x1xf32>
    %37 = vector.broadcast %36 : vector<4x8x1xf32> to vector<4x8x8xf32>
    %38 = arith.mulf %33, %37 : vector<4x8x8xf32>
    %39 = arith.truncf %38 : vector<4x8x8xf32> to vector<4x8x8xbf16>
    %40 = arith.truncf %25 : vector<4x8x8xf32> to vector<4x8x8xbf16>
    "tpu.trace_start"() <{level = 10 : i32, message = "hqk,hke->hqe"}> : () -> ()
    %cst_32 = arith.constant dense<0.000000e+00> : vector<4x8x8xf32>
    %41 = tpu.matmul %39, %40, %cst_32 {dimension_numbers = #tpu.dot_dimension_numbers<[2], [1], [1], [2], [0, 0, 0, 1, 1, 2], [0], [0]>} : vector<4x8x8xbf16>, vector<4x8x8xbf16>, vector<4x8x8xf32> -> vector<4x8x8xf32>
    "tpu.trace_stop"() : () -> ()
    %42 = arith.truncf %41 : vector<4x8x8xf32> to vector<4x8x8xbf16>
    "tpu.trace_start"() <{level = 10 : i32, message = "hqe,hed->hqd"}> : () -> ()
    %cst_33 = arith.constant dense<0.000000e+00> : vector<4x8x32xf32>
    %43 = tpu.matmul %42, %10, %cst_33 {dimension_numbers = #tpu.dot_dimension_numbers<[2], [1], [1], [2], [0, 0, 0, 1, 1, 2], [0], [0]>} : vector<4x8x8xbf16>, vector<4x8x32xbf16>, vector<4x8x32xf32> -> vector<4x8x32xf32>
    "tpu.trace_stop"() : () -> ()
    %cst_34 = arith.constant dense<0.000000e+00> : vector<8x32xf32>
    %44 = vector.multi_reduction <add>, %43, %cst_34 [0] : vector<4x8x32xf32> to vector<8x32xf32>
    %45 = arith.addf %0, %44 : vector<8x32xf32>
    %cst_35 = arith.constant dense<0.000000e+00> : vector<8xf32>
    %46 = vector.multi_reduction <add>, %45, %cst_35 [1] : vector<8x32xf32> to vector<8xf32>
    %47 = vector.shape_cast %46 : vector<8xf32> to vector<8x1xf32>
    %cst_36 = arith.constant 3.200000e+01 : f32
    %48 = vector.broadcast %cst_36 : f32 to vector<8x1xf32>
    %49 = arith.divf %47, %48 : vector<8x1xf32>
    %50 = vector.broadcast %49 : vector<8x1xf32> to vector<8x32xf32>
    %51 = arith.subf %45, %50 : vector<8x32xf32>
    %52 = arith.mulf %51, %51 : vector<8x32xf32>
    %cst_37 = arith.constant dense<0.000000e+00> : vector<8xf32>
    %53 = vector.multi_reduction <add>, %52, %cst_37 [1] : vector<8x32xf32> to vector<8xf32>
    %54 = vector.shape_cast %53 : vector<8xf32> to vector<8x1xf32>
    %cst_38 = arith.constant 3.200000e+01 : f32
    %55 = vector.broadcast %cst_38 : f32 to vector<8x1xf32>
    %56 = arith.divf %54, %55 : vector<8x1xf32>
    %57 = vector.broadcast %49 : vector<8x1xf32> to vector<8x32xf32>
    %58 = arith.subf %45, %57 : vector<8x32xf32>
    %cst_39 = arith.constant 9.99999974E-6 : f32
    %59 = vector.broadcast %cst_39 : f32 to vector<8x1xf32>
    %60 = arith.addf %56, %59 : vector<8x1xf32>
    %61 = math.rsqrt %60 : vector<8x1xf32>
    %62 = vector.broadcast %61 : vector<8x1xf32> to vector<8x32xf32>
    %63 = arith.mulf %58, %62 : vector<8x32xf32>
    %64 = vector.broadcast %2 : vector<1x32xf32> to vector<8x32xf32>
    %65 = arith.mulf %63, %64 : vector<8x32xf32>
    %66 = vector.broadcast %3 : vector<1x32xf32> to vector<8x32xf32>
    %67 = arith.addf %65, %66 : vector<8x32xf32>
    %c0_40 = arith.constant 0 : index
    %c0_41 = arith.constant 0 : index
    %c0_42 = arith.constant 0 : index
    %68 = vector.load %arg6[%c0_40, %c0_41, %c0_42] : memref<4x8x32xbf16, #tpu.memory_space<vmem>>, vector<4x8x32xbf16>
    %69 = arith.truncf %67 : vector<8x32xf32> to vector<8x32xbf16>
    %70 = vector.shape_cast %69 : vector<8x32xbf16> to vector<1x8x32xbf16>
    %71 = vector.broadcast %70 : vector<1x8x32xbf16> to vector<4x8x32xbf16>
    %72 = arith.truncf %1 : vector<8x32xf32> to vector<8x32xbf16>
    %73 = vector.shape_cast %72 : vector<8x32xbf16> to vector<1x8x32xbf16>
    %74 = vector.broadcast %73 : vector<1x8x32xbf16> to vector<4x8x32xbf16>
    %c0_43 = arith.constant 0 : index
    %c0_44 = arith.constant 0 : index
    %c0_45 = arith.constant 0 : index
    %c0_46 = arith.constant 0 : index
    %75 = vector.load %arg5[%c0_43, %c0_44, %c0_45, %c0_46] : memref<3x4x32x8xbf16, #tpu.memory_space<vmem>>, vector<1x4x32x8xbf16>
    %76 = vector.shape_cast %75 : vector<1x4x32x8xbf16> to vector<4x32x8xbf16>
    "tpu.trace_start"() <{level = 10 : i32, message = "hsd,hde->hse"}> : () -> ()
    %cst_47 = arith.constant dense<0.000000e+00> : vector<4x8x8xf32>
    %77 = tpu.matmul %71, %76, %cst_47 {dimension_numbers = #tpu.dot_dimension_numbers<[2], [1], [1], [2], [0, 0, 0, 1, 1, 2], [0], [0]>} : vector<4x8x32xbf16>, vector<4x32x8xbf16>, vector<4x8x8xf32> -> vector<4x8x8xf32>
    "tpu.trace_stop"() : () -> ()
    %c1_48 = arith.constant 1 : index
    %c0_49 = arith.constant 0 : index
    %c0_50 = arith.constant 0 : index
    %c0_51 = arith.constant 0 : index
    %78 = vector.load %arg5[%c1_48, %c0_49, %c0_50, %c0_51] : memref<3x4x32x8xbf16, #tpu.memory_space<vmem>>, vector<1x4x32x8xbf16>
    %79 = vector.shape_cast %78 : vector<1x4x32x8xbf16> to vector<4x32x8xbf16>
    "tpu.trace_start"() <{level = 10 : i32, message = "hsd,hde->hse"}> : () -> ()
    %cst_52 = arith.constant dense<0.000000e+00> : vector<4x8x8xf32>
    %80 = tpu.matmul %74, %79, %cst_52 {dimension_numbers = #tpu.dot_dimension_numbers<[2], [1], [1], [2], [0, 0, 0, 1, 1, 2], [0], [0]>} : vector<4x8x32xbf16>, vector<4x32x8xbf16>, vector<4x8x8xf32> -> vector<4x8x8xf32>
    "tpu.trace_stop"() : () -> ()
    %c2_53 = arith.constant 2 : index
    %c0_54 = arith.constant 0 : index
    %c0_55 = arith.constant 0 : index
    %c0_56 = arith.constant 0 : index
    %81 = vector.load %arg5[%c2_53, %c0_54, %c0_55, %c0_56] : memref<3x4x32x8xbf16, #tpu.memory_space<vmem>>, vector<1x4x32x8xbf16>
    %82 = vector.shape_cast %81 : vector<1x4x32x8xbf16> to vector<4x32x8xbf16>
    "tpu.trace_start"() <{level = 10 : i32, message = "hsd,hde->hse"}> : () -> ()
    %cst_57 = arith.constant dense<0.000000e+00> : vector<4x8x8xf32>
    %83 = tpu.matmul %74, %82, %cst_57 {dimension_numbers = #tpu.dot_dimension_numbers<[2], [1], [1], [2], [0, 0, 0, 1, 1, 2], [0], [0]>} : vector<4x8x32xbf16>, vector<4x32x8xbf16>, vector<4x8x8xf32> -> vector<4x8x8xf32>
    "tpu.trace_stop"() : () -> ()
    %84 = arith.truncf %77 : vector<4x8x8xf32> to vector<4x8x8xbf16>
    %85 = arith.truncf %80 : vector<4x8x8xf32> to vector<4x8x8xbf16>
    "tpu.trace_start"() <{level = 10 : i32, message = "hqe,hke->hqk"}> : () -> ()
    %cst_58 = arith.constant dense<0.000000e+00> : vector<4x8x8xf32>
    %86 = tpu.matmul %84, %85, %cst_58 {dimension_numbers = #tpu.dot_dimension_numbers<[2], [2], [1], [1], [0, 0, 0, 1, 1, 1], [0], [0]>} : vector<4x8x8xbf16>, vector<4x8x8xbf16>, vector<4x8x8xf32> -> vector<4x8x8xf32>
    "tpu.trace_stop"() : () -> ()
    %cst_59 = arith.constant dense<0xFF800000> : vector<4x8xf32>
    %87 = vector.multi_reduction <maximumf>, %86, %cst_59 [2] : vector<4x8x8xf32> to vector<4x8xf32>
    %88 = vector.shape_cast %87 : vector<4x8xf32> to vector<4x8x1xf32>
    %89 = vector.broadcast %88 : vector<4x8x1xf32> to vector<4x8x8xf32>
    %90 = arith.subf %86, %89 : vector<4x8x8xf32>
    %91 = math.exp %90 : vector<4x8x8xf32>
    %cst_60 = arith.constant dense<0.000000e+00> : vector<4x8xf32>
    %92 = vector.multi_reduction <add>, %91, %cst_60 [2] : vector<4x8x8xf32> to vector<4x8xf32>
    %93 = vector.shape_cast %92 : vector<4x8xf32> to vector<4x8x1xf32>
    %94 = tpu.reciprocal %93 {approx = true} : vector<4x8x1xf32> -> vector<4x8x1xf32>
    %95 = vector.broadcast %94 : vector<4x8x1xf32> to vector<4x8x8xf32>
    %96 = arith.mulf %91, %95 : vector<4x8x8xf32>
    %97 = arith.truncf %96 : vector<4x8x8xf32> to vector<4x8x8xbf16>
    %98 = arith.truncf %83 : vector<4x8x8xf32> to vector<4x8x8xbf16>
    "tpu.trace_start"() <{level = 10 : i32, message = "hqk,hke->hqe"}> : () -> ()
    %cst_61 = arith.constant dense<0.000000e+00> : vector<4x8x8xf32>
    %99 = tpu.matmul %97, %98, %cst_61 {dimension_numbers = #tpu.dot_dimension_numbers<[2], [1], [1], [2], [0, 0, 0, 1, 1, 2], [0], [0]>} : vector<4x8x8xbf16>, vector<4x8x8xbf16>, vector<4x8x8xf32> -> vector<4x8x8xf32>
    "tpu.trace_stop"() : () -> ()
    %100 = arith.truncf %99 : vector<4x8x8xf32> to vector<4x8x8xbf16>
    "tpu.trace_start"() <{level = 10 : i32, message = "hqe,hed->hqd"}> : () -> ()
    %cst_62 = arith.constant dense<0.000000e+00> : vector<4x8x32xf32>
    %101 = tpu.matmul %100, %68, %cst_62 {dimension_numbers = #tpu.dot_dimension_numbers<[2], [1], [1], [2], [0, 0, 0, 1, 1, 2], [0], [0]>} : vector<4x8x8xbf16>, vector<4x8x32xbf16>, vector<4x8x32xf32> -> vector<4x8x32xf32>
    "tpu.trace_stop"() : () -> ()
    %cst_63 = arith.constant dense<0.000000e+00> : vector<8x32xf32>
    %102 = vector.multi_reduction <add>, %101, %cst_63 [0] : vector<4x8x32xf32> to vector<8x32xf32>
    %103 = arith.addf %67, %102 : vector<8x32xf32>
    %cst_64 = arith.constant dense<0.000000e+00> : vector<8xf32>
    %104 = vector.multi_reduction <add>, %103, %cst_64 [1] : vector<8x32xf32> to vector<8xf32>
    %105 = vector.shape_cast %104 : vector<8xf32> to vector<8x1xf32>
    %cst_65 = arith.constant 3.200000e+01 : f32
    %106 = vector.broadcast %cst_65 : f32 to vector<8x1xf32>
    %107 = arith.divf %105, %106 : vector<8x1xf32>
    %108 = vector.broadcast %107 : vector<8x1xf32> to vector<8x32xf32>
    %109 = arith.subf %103, %108 : vector<8x32xf32>
    %110 = arith.mulf %109, %109 : vector<8x32xf32>
    %cst_66 = arith.constant dense<0.000000e+00> : vector<8xf32>
    %111 = vector.multi_reduction <add>, %110, %cst_66 [1] : vector<8x32xf32> to vector<8xf32>
    %112 = vector.shape_cast %111 : vector<8xf32> to vector<8x1xf32>
    %cst_67 = arith.constant 3.200000e+01 : f32
    %113 = vector.broadcast %cst_67 : f32 to vector<8x1xf32>
    %114 = arith.divf %112, %113 : vector<8x1xf32>
    %115 = vector.broadcast %107 : vector<8x1xf32> to vector<8x32xf32>
    %116 = arith.subf %103, %115 : vector<8x32xf32>
    %cst_68 = arith.constant 9.99999974E-6 : f32
    %117 = vector.broadcast %cst_68 : f32 to vector<8x1xf32>
    %118 = arith.addf %114, %117 : vector<8x1xf32>
    %119 = math.rsqrt %118 : vector<8x1xf32>
    %120 = vector.broadcast %119 : vector<8x1xf32> to vector<8x32xf32>
    %121 = arith.mulf %116, %120 : vector<8x32xf32>
    %122 = vector.broadcast %4 : vector<1x32xf32> to vector<8x32xf32>
    %123 = arith.mulf %121, %122 : vector<8x32xf32>
    %124 = vector.broadcast %5 : vector<1x32xf32> to vector<8x32xf32>
    %125 = arith.addf %123, %124 : vector<8x32xf32>
    %126 = arith.truncf %125 : vector<8x32xf32> to vector<8x32xbf16>
    %c0_69 = arith.constant 0 : index
    %c0_70 = arith.constant 0 : index
    %127 = vector.load %arg7[%c0_69, %c0_70] : memref<32x64xbf16, #tpu.memory_space<vmem>>, vector<32x64xbf16>
    %cst_71 = arith.constant dense<0.000000e+00> : vector<8x64xf32>
    %128 = tpu.matmul %126, %127, %cst_71 {dimension_numbers = #tpu.dot_dimension_numbers<[1], [0], [0], [1], [0, 0, 1, 1], [], []>} : vector<8x32xbf16>, vector<32x64xbf16>, vector<8x64xf32> -> vector<8x64xf32>
    %129 = vector.broadcast %9 : vector<1x64xf32> to vector<8x64xf32>
    %130 = arith.addf %128, %129 : vector<8x64xf32>
    %cst_72 = arith.constant 0.000000e+00 : f32
    %131 = vector.broadcast %cst_72 : f32 to vector<8x64xf32>
    %132 = arith.maximumf %130, %131 : vector<8x64xf32>
    %133 = arith.truncf %132 : vector<8x64xf32> to vector<8x64xbf16>
    %c0_73 = arith.constant 0 : index
    %c0_74 = arith.constant 0 : index
    %134 = vector.load %arg8[%c0_73, %c0_74] : memref<64x32xbf16, #tpu.memory_space<vmem>>, vector<64x32xbf16>
    %cst_75 = arith.constant dense<0.000000e+00> : vector<8x32xf32>
    %135 = tpu.matmul %133, %134, %cst_75 {dimension_numbers = #tpu.dot_dimension_numbers<[1], [0], [0], [1], [0, 0, 1, 1], [], []>} : vector<8x64xbf16>, vector<64x32xbf16>, vector<8x32xf32> -> vector<8x32xf32>
    %136 = vector.broadcast %8 : vector<1x32xf32> to vector<8x32xf32>
    %137 = arith.addf %135, %136 : vector<8x32xf32>
    %138 = arith.addf %125, %137 : vector<8x32xf32>
    %cst_76 = arith.constant dense<0.000000e+00> : vector<8xf32>
    %139 = vector.multi_reduction <add>, %138, %cst_76 [1] : vector<8x32xf32> to vector<8xf32>
    %140 = vector.shape_cast %139 : vector<8xf32> to vector<8x1xf32>
    %cst_77 = arith.constant 3.200000e+01 : f32
    %141 = vector.broadcast %cst_77 : f32 to vector<8x1xf32>
    %142 = arith.divf %140, %141 : vector<8x1xf32>
    %143 = vector.broadcast %142 : vector<8x1xf32> to vector<8x32xf32>
    %144 = arith.subf %138, %143 : vector<8x32xf32>
    %145 = arith.mulf %144, %144 : vector<8x32xf32>
    %cst_78 = arith.constant dense<0.000000e+00> : vector<8xf32>
    %146 = vector.multi_reduction <add>, %145, %cst_78 [1] : vector<8x32xf32> to vector<8xf32>
    %147 = vector.shape_cast %146 : vector<8xf32> to vector<8x1xf32>
    %cst_79 = arith.constant 3.200000e+01 : f32
    %148 = vector.broadcast %cst_79 : f32 to vector<8x1xf32>
    %149 = arith.divf %147, %148 : vector<8x1xf32>
    %150 = vector.broadcast %142 : vector<8x1xf32> to vector<8x32xf32>
    %151 = arith.subf %138, %150 : vector<8x32xf32>
    %cst_80 = arith.constant 9.99999974E-6 : f32
    %152 = vector.broadcast %cst_80 : f32 to vector<8x1xf32>
    %153 = arith.addf %149, %152 : vector<8x1xf32>
    %154 = math.rsqrt %153 : vector<8x1xf32>
    %155 = vector.broadcast %154 : vector<8x1xf32> to vector<8x32xf32>
    %156 = arith.mulf %151, %155 : vector<8x32xf32>
    %157 = vector.broadcast %6 : vector<1x32xf32> to vector<8x32xf32>
    %158 = arith.mulf %156, %157 : vector<8x32xf32>
    %159 = vector.broadcast %7 : vector<1x32xf32> to vector<8x32xf32>
    %160 = arith.addf %158, %159 : vector<8x32xf32>
    %c0_81 = arith.constant 0 : index
    %c0_82 = arith.constant 0 : index
    %161 = vector.load %arg10[%c0_81, %c0_82] : memref<8x32xf32, #tpu.memory_space<vmem>>, vector<8x32xf32>
    tpu.vector_store %arg10[%c0_81, %c0_82], %160 {strides = array<i32>} : memref<8x32xf32, #tpu.memory_space<vmem>>, vector<8x32xf32>,
    return
  }
  func.func @transform_0(%arg0: i32) -> (i32, i32) {
    %c0_i32 = arith.constant 0 : i32
    %c0_i32_0 = arith.constant 0 : i32
    return %arg0, %c0_i32 : i32, i32
  }
  func.func @transform_1(%arg0: i32) -> (i32, i32) {
    %c0_i32 = arith.constant 0 : i32
    %c0_i32_0 = arith.constant 0 : i32
    return %arg0, %c0_i32 : i32, i32
  }
  func.func @transform_2(%arg0: i32) -> (i32, i32, i32, i32) {
    %c0_i32 = arith.constant 0 : i32
    %c0_i32_0 = arith.constant 0 : i32
    %c0_i32_1 = arith.constant 0 : i32
    %c0_i32_2 = arith.constant 0 : i32
    %c0_i32_3 = arith.constant 0 : i32
    return %c0_i32, %c0_i32_0, %c0_i32_1, %c0_i32_2 : i32, i32, i32, i32
  }
  func.func @transform_3(%arg0: i32) -> (i32, i32, i32) {
    %c0_i32 = arith.constant 0 : i32
    %c0_i32_0 = arith.constant 0 : i32
    %c0_i32_1 = arith.constant 0 : i32
    %c0_i32_2 = arith.constant 0 : i32
    return %c0_i32, %c0_i32_0, %c0_i32_1 : i32, i32, i32
  }
  func.func @transform_4(%arg0: i32) -> (i32, i32, i32, i32) {
    %c0_i32 = arith.constant 0 : i32
    %c0_i32_0 = arith.constant 0 : i32
    %c0_i32_1 = arith.constant 0 : i32
    %c0_i32_2 = arith.constant 0 : i32
    %c0_i32_3 = arith.constant 0 : i32
    return %c0_i32, %c0_i32_0, %c0_i32_1, %c0_i32_2 : i32, i32, i32, i32
  }
  func.func @transform_5(%arg0: i32) -> (i32, i32, i32) {
    %c0_i32 = arith.constant 0 : i32
    %c0_i32_0 = arith.constant 0 : i32
    %c0_i32_1 = arith.constant 0 : i32
    %c0_i32_2 = arith.constant 0 : i32
    return %c0_i32, %c0_i32_0, %c0_i32_1 : i32, i32, i32
  }
  func.func @transform_6(%arg0: i32) -> (i32, i32) {
    %c0_i32 = arith.constant 0 : i32
    %c0_i32_0 = arith.constant 0 : i32
    %c0_i32_1 = arith.constant 0 : i32
    return %c0_i32, %c0_i32_0 : i32, i32
  }
  func.func @transform_7(%arg0: i32) -> (i32, i32) {
    %c0_i32 = arith.constant 0 : i32
    %c0_i32_0 = arith.constant 0 : i32
    %c0_i32_1 = arith.constant 0 : i32
    return %c0_i32, %c0_i32_0 : i32, i32
  }
  func.func @transform_8(%arg0: i32) -> (i32, i32) {
    %c0_i32 = arith.constant 0 : i32
    %c0_i32_0 = arith.constant 0 : i32
    %c0_i32_1 = arith.constant 0 : i32
    return %c0_i32, %c0_i32_0 : i32, i32
  }
  func.func @transform_9(%arg0: i32) -> (i32, i32) {
    %c0_i32 = arith.constant 0 : i32
    %c0_i32_0 = arith.constant 0 : i32
    return %arg0, %c0_i32 : i32, i32
  }
}

</mosaic_0001>

<bundles_post_ra>
// kernel: tpu_custom_call.1
= control target key start
LH: loop header
LB: loop body
LE: loop exit
PB: predicated region body
PF: predicated region fallthrough
CT: control target
= control target key end

     0   :  { %14 = vsyncpa [#allocation3], 0  ;;  %s4841_s0 = inlined_call_operand.vmem [shape: f32[16,32], index: 0, kind: input, shape index: {}]   ;;  %s4842_s1 = inlined_call_operand.vmem [shape: f32[16,32], index: 1, kind: input, shape index: {}]   ;;  %s4843_s2 = inlined_call_operand.vmem [shape: bf16[3,4,32,8], index: 2, kind: input, shape index: {}]   ;;  %s4844_s3 = inlined_call_operand.vmem [shape: bf16[4,8,32], index: 3, kind: input, shape index: {}]   ;;  %s4845_s4 = inlined_call_operand.vmem [shape: bf16[3,4,32,8], index: 4, kind: input, shape index: {}]   ;;  %s4846_s5 = inlined_call_operand.vmem [shape: bf16[4,8,32], index: 5, kind: input, shape index: {}]   ;;  %s4847_s6 = inlined_call_operand.vmem [shape: bf16[32,64], index: 6, kind: input, shape index: {}]   ;;  %s4848_s7 = inlined_call_operand.vmem [shape: bf16[64,32], index: 7, kind: input, shape index: {}]   ;;  %s4849_s8 = inlined_call_operand.vmem [shape: f32[8,64], index: 8, kind: input, shape index: {}]   ;;  %s4850_s9 = inlined_call_operand.hbm [shape: f32[16,32], index: 9, kind: output, shape index: {}]  }
   0x1   :  { %16 = vsyncpa [#allocation3 + $0x1], 0  ;;  %s4199_s30 = smov 0   ;;  %s4201_s10 = smov 0  }
   0x2   :  { %s4203_s11 = smov 0   ;;  %s4205_s12 = smov 0  }
   0x3 LB: > { %s4220_s13 = sadd.s32 4294967295, %s4144_s12   ;;  %s3278_s14 = sadd.s32 4294967294, %s4144_s12   ;;  %s4144_s12 = sphi %s4205_s12, %s4856_s12   ;;  %s4140_s11 = sphi %s4203_s11, %s4855_s11   ;;  %s4136_s10 = sphi %s4201_s10, %s4854_s10   ;;  %s4132_s30 = sphi %s4199_s30, %s4853_s30  }
   0x4   : > { %s4224_s15 = sadd.s32 1, %s4144_s12   ;;  %s228_s16 = sadd.s32 1, %s4140_s11 }
   0x5   : > { %s225_s17 = ssub.s32 %s4144_s12, %s4224_s15  ;;  %p238_p0 = scmp.ne.s32.totalorder %s4140_s11, %s4136_s10 }
   0x6   : > { %p226_p1 = scmp.eq.s32.totalorder %s225_s17, 0  ;;  %p239_p2 = scmp.eq.s32.totalorder %s4220_s13, 1 }
   0x7   : > { %p244_p3 = scmp.ne.s32.totalorder %s4136_s10, %s4132_s30  ;;  %p245_p4 = scmp.eq.s32.totalorder %s3278_s14, 1 }
   0x8   : > { %s4235_s18 = scalar_select %p226_p1, %s4140_s11, %s228_s16  }
   0x9   : > { %p4237_p5 = por %p239_p2, %p238_p0  ;;  %p4241_p6 = por %p245_p4, %p244_p3 }
   0xa   : > { %p3281_p7 = scmp.ge.s32.totalorder %s4144_s12, 1  ;;  %p298_p8 = scmp.lt.s32.totalorder %s4144_s12, 3 }
   0xc   : > { %p299_p9 = pnand %p3281_p7, %p298_p8 }
   0xd   : > { %v3990_v0 = vld [vmem:[%s4843_s2] sm:$0xff] (!%p299_p9)   ;;  %v4146_v1 = vmov (!%p299_p9), 0.0   ;;  %v3991_v2 = vld [vmem:[%s4843_s2 + $0x10] sm:$0xff] (!%p299_p9)   ;;  %v3992_v3 = vld [vmem:[%s4843_s2 + $0x8] sm:$0xff] (!%p299_p9)   ;;  %vm4147_vm0 = vmmov (!%p299_p9), 0   ;;  %p337_p10 = scmp.lt.s32.totalorder (!%p299_p9), %s4220_s13, 1 }
   0xe   : > { %302 = sbr.rel (%p299_p9) target bundleno = 3836 (0xefc), region = 56  ;;  %3593 = vmatprep.subr.bf16.mxu0 (!%p299_p9), %v4146_v1  ;;  %3601 = vmatprep.subr.bf16.mxu1 (!%p299_p9), %v4146_v1  ;;  %v3993_v4 = vld [vmem:[%s4843_s2 + $0x18] sm:$0xff] (!%p299_p9)   ;;  %v3994_v5 = vld [vmem:[%s4843_s2 + $0x20] sm:$0xff] (!%p299_p9)   ;;  %v3995_v6 = vld [vmem:[%s4843_s2 + $0x30] sm:$0xff] (!%p299_p9)   ;;  %vm389_vm1 = vcmask (!%p299_p9), 261120   ;;  %vm1047_vm2 = vcmask (!%p299_p9), 64512  }
   0xf   : > { %3594 = vmatpush3.bf16.msra.mxu0 (!%p299_p9), %v3990_v0  ;;  %3597 = vmatprep.mubr.msk.bf16.mxu0 (!%p299_p9), %vm4147_vm0, %v4146_v1  ;;  %v3996_v9 = vld [vmem:[%s4843_s2 + $0x28] sm:$0xff] (!%p299_p9)   ;;  %v3997_v10 = vld [vmem:[%s4843_s2 + $0x38] sm:$0xff] (!%p299_p9)   ;;  %v3998_v11 = vld [vmem:[%s4843_s2 + $0x40] sm:$0xff] (!%p299_p9)   ;;  %vm1287_vm3 = vcmask (!%p299_p9), 1043456   ;;  %vm3124_vm4 = vcmask (!%p299_p9), 523264   ;;  %s3462_s16 = sshll.u32 (!%p299_p9), %s4220_s13, 7 }
  0x10   : > { %3602 = vmatpush3.bf16.msra.mxu1 (!%p299_p9), %v3991_v2  ;;  %3595 = vmatprep.subr.bf16.mxu0 (!%p299_p9), %v4146_v1  ;;  %v3999_v12 = vld [vmem:[%s4843_s2 + $0x50] sm:$0xff] (!%p299_p9)   ;;  %v4000_v13 = vld [vmem:[%s4843_s2 + $0x48] sm:$0xff] (!%p299_p9)   ;;  %v4001_v14 = vld [vmem:[%s4843_s2 + $0x58] sm:$0xff] (!%p299_p9)   ;;  %s4798_s22 = scalar_lea.hbm (!%p299_p9), %s4850_s9, %s3462_s16 }
  0x11   : > { %3603 = vmatprep.subr.bf16.mxu1 (!%p299_p9), %v4146_v1  ;;  %3605 = vmatprep.mubr.msk.bf16.mxu1 (!%p299_p9), %vm4147_vm0, %v4146_v1  ;;  %v4002_v15 = vld [vmem:[%s4843_s2 + $0x60] sm:$0xff] (!%p299_p9)   ;;  %v4003_v16 = vld [vmem:[%s4843_s2 + $0x70] sm:$0xff] (!%p299_p9)   ;;  %v4004_v17 = vld [vmem:[%s4843_s2 + $0x68] sm:$0xff] (!%p299_p9)  }
  0x12   : > { %v4005_v18 = vld [vmem:[%s4843_s2 + $0x78] sm:$0xff] (!%p299_p9)   ;;  %v4006_v19 = vld [vmem:[%s4843_s2 + $0x80] sm:$0xff] (!%p299_p9)   ;;  %v4007_v20 = vld [vmem:[%s4843_s2 + $0x90] sm:$0xff] (!%p299_p9)  }
  0x13   : > { %3596 = vmatpush3.bf16.msra.mxu0 (!%p299_p9), %v3992_v3  ;;  %v4008_v21 = vld [vmem:[%s4843_s2 + $0x88] sm:$0xff] (!%p299_p9)   ;;  %v4009_v22 = vld [vmem:[%s4843_s2 + $0x98] sm:$0xff] (!%p299_p9)   ;;  %v4010_v23 = vld [vmem:[%s4843_s2 + $0xa0] sm:$0xff] (!%p299_p9)  }
  0x14   : > { %3604 = vmatpush3.bf16.msra.mxu1 (!%p299_p9), %v3993_v4  ;;  %3609 = vmatprep.subr.bf16.mxu0 (!%p299_p9), %v4146_v1  ;;  %v4011_v24 = vld [vmem:[%s4843_s2 + $0xb0] sm:$0xff] (!%p299_p9)   ;;  %v4012_v25 = vld [vmem:[%s4843_s2 + $0xa8] sm:$0xff] (!%p299_p9)   ;;  %v4013_v26 = vld [vmem:[%s4843_s2 + $0xb8] sm:$0xff] (!%p299_p9)  }
  0x15   : > { %s4269_s29 = scalar_select %p337_p10, %s4220_s13, 1  ;;  %3617 = vmatprep.subr.bf16.mxu1 %v4146_v1 }
  0x16   : > { %s4148_s13 = smov [#allocation2]  }
  0x17   : > { %s3283_s14 = sshll.u32 %s4269_s29, 3 }
  0x18   : > { %s340_s23 = scalar_lea.vmem %s4841_s0, %s3283_s14  ;;  %s344_s26 = scalar_lea.vmem %s4842_s1, %s3283_s14 }
  0x19   : > { %v4284_v7 = vld [vmem:[%s340_s23] sm:$0xff]  ;;  %s334_s23 = sand.u32 1, %s4136_s10  }
  0x1a   : > { %v4289_v8 = vpack.c.bf16 %v4284_v7, %v4284_v7  ;;  %s3282_s24 = sshll.u32 %s334_s23, 3  ;;  %s3194_s25 = scalar_lea.sflag [#allocation3], %s334_s23 }
  0x1b   : > { %s336_s17 = scalar_lea.vmem [#allocation2], %s3282_s24  ;;  %s4086_s24 = sshll.u32 %s4148_s13, 4  ;;  %s4087_s24 = int_to_ptr.vmem [resolvable:$false] %s4086_s24 }
  0x1c   : > { %3598 = vmatmul.mubr.msk.bf16.vlgmr.msra.gmra.mrb[0].mxu0 %vm389_vm1, %v4289_v8  ;;  %3606 = vmatmul.mubr.msk.bf16.vlgmr.msra.gmra.mrb[0].mxu1 %vm389_vm1, %v4289_v8  ;;  %s3207_s29 = sshll.u32 %s336_s17, 4  ;;  %s4088_s27 = scalar_lea.vmem %s4087_s24, 256  ;;  %s4800_s29 = int_to_ptr.vmem [resolvable:$true] %s3207_s29 }
  0x1d   : > { %3610 = vmatpush3.bf16.msra.mxu0 %v3994_v5  ;;  %3618 = vmatpush3.bf16.msra.mxu1 %v3995_v6  ;;  %p4089_p0 = scmp.lt.s32.totalorder %s4800_s29, %s4087_s24 }
  0x1e   : > { %3611 = vmatprep.subr.bf16.mxu0 %v4146_v1  ;;  %3619 = vmatprep.subr.bf16.mxu1 %v4146_v1 }
  0x1f   : > { %3613 = vmatprep.mubr.msk.bf16.mxu0 %vm4147_vm0, %v4146_v1  ;;  %3621 = vmatprep.mubr.msk.bf16.mxu1 %vm4147_vm0, %v4146_v1 }
  0x21   : > { %3612 = vmatpush3.bf16.msra.mxu0 %v3996_v9  ;;  %3620 = vmatpush3.bf16.msra.mxu1 %v3997_v10 }
  0x22   : > { %3625 = vmatprep.subr.bf16.mxu0 %v4146_v1  ;;  %3633 = vmatprep.subr.bf16.mxu1 %v4146_v1 }
  0x24   : > { %3614 = vmatmul.mubr.msk.bf16.vlgmr.msra.gmra.mrb[4].mxu0 %vm389_vm1, %v4289_v8  ;;  %3622 = vmatmul.mubr.msk.bf16.vlgmr.msra.gmra.mrb[4].mxu1 %vm389_vm1, %v4289_v8 }
  0x25   : > { %3626 = vmatpush3.bf16.msra.mxu0 %v3998_v11  ;;  %3634 = vmatpush3.bf16.msra.mxu1 %v3999_v12 }
  0x26   : > { %3627 = vmatprep.subr.bf16.mxu0 %v4146_v1  ;;  %3635 = vmatprep.subr.bf16.mxu1 %v4146_v1 }
  0x27   : > { %3629 = vmatprep.mubr.msk.bf16.mxu0 %vm4147_vm0, %v4146_v1  ;;  %3637 = vmatprep.mubr.msk.bf16.mxu1 %vm4147_vm0, %v4146_v1 }
  0x29   : > { %3628 = vmatpush3.bf16.msra.mxu0 %v4000_v13  ;;  %3636 = vmatpush3.bf16.msra.mxu1 %v4001_v14 }
  0x2a   : > { %3641 = vmatprep.subr.bf16.mxu0 %v4146_v1  ;;  %3649 = vmatprep.subr.bf16.mxu1 %v4146_v1 }
  0x2c   : > { %3630 = vmatmul.mubr.msk.bf16.vlgmr.msra.gmra.mrb[8].mxu0 %vm389_vm1, %v4289_v8  ;;  %3638 = vmatmul.mubr.msk.bf16.vlgmr.msra.gmra.mrb[8].mxu1 %vm389_vm1, %v4289_v8 }
  0x2d   : > { %3642 = vmatpush3.bf16.msra.mxu0 %v4002_v15  ;;  %3650 = vmatpush3.bf16.msra.mxu1 %v4003_v16 }
  0x2e   : > { %3643 = vmatprep.subr.bf16.mxu0 %v4146_v1  ;;  %3651 = vmatprep.subr.bf16.mxu1 %v4146_v1 }
  0x2f   : > { %3645 = vmatprep.mubr.msk.bf16.mxu0 %vm4147_vm0, %v4146_v1  ;;  %3653 = vmatprep.mubr.msk.bf16.mxu1 %vm4147_vm0, %v4146_v1 }
  0x31   : > { %3644 = vmatpush3.bf16.msra.mxu0 %v4004_v17  ;;  %3652 = vmatpush3.bf16.msra.mxu1 %v4005_v18 }
  0x32   : > { %3657 = vmatprep.subr.bf16.mxu0 %v4146_v1  ;;  %3665 = vmatprep.subr.bf16.mxu1 %v4146_v1 }
  0x34   : > { %3646 = vmatmul.mubr.msk.bf16.vlgmr.msra.gmra.mrb[12].mxu0 %vm389_vm1, %v4289_v8  ;;  %3654 = vmatmul.mubr.msk.bf16.vlgmr.msra.gmra.mrb[12].mxu1 %vm389_vm1, %v4289_v8 }
  0x35   : > { %3658 = vmatpush3.bf16.msra.mxu0 %v4006_v19  ;;  %3666 = vmatpush3.bf16.msra.mxu1 %v4007_v20 }
  0x36   : > { %3659 = vmatprep.subr.bf16.mxu0 %v4146_v1  ;;  %3667 = vmatprep.subr.bf16.mxu1 %v4146_v1 }
  0x37   : > { %3661 = vmatprep.mubr.msk.bf16.mxu0 %vm4147_vm0, %v4146_v1  ;;  %3669 = vmatprep.mubr.msk.bf16.mxu1 %vm4147_vm0, %v4146_v1 }
  0x39   : > { %3660 = vmatpush3.bf16.msra.mxu0 %v4008_v21  ;;  %3668 = vmatpush3.bf16.msra.mxu1 %v4009_v22 }
  0x3a   : > { %3673 = vmatprep.subr.bf16.mxu0 %v4146_v1  ;;  %3681 = vmatprep.subr.bf16.mxu1 %v4146_v1 }
  0x3c   : > { %3662 = vmatmul.mubr.msk.bf16.vlgmr.msra.gmra.mrb[16].mxu0 %vm389_vm1, %v4289_v8  ;;  %3670 = vmatmul.mubr.msk.bf16.vlgmr.msra.gmra.mrb[16].mxu1 %vm389_vm1, %v4289_v8 }
  0x3d   : > { %3674 = vmatpush3.bf16.msra.mxu0 %v4010_v23  ;;  %3677 = vmatprep.mubr.msk.bf16.mxu0 %vm4147_vm0, %v4146_v1 }
  0x3e   : > { %3675 = vmatprep.subr.bf16.mxu0 %v4146_v1  ;;  %3682 = vmatpush3.bf16.msra.mxu1 %v4011_v24 }
  0x3f   : > { %3685 = vmatprep.mubr.msk.bf16.mxu1 %vm4147_vm0, %v4146_v1  ;;  %3683 = vmatprep.subr.bf16.mxu1 %v4146_v1 }
  0x41   : > { %3676 = vmatpush3.bf16.msra.mxu0 %v4012_v25 }
  0x42   : > { %3684 = vmatpush3.bf16.msra.mxu1 %v4013_v26  ;;  %3689 = vmatprep.subr.bf16.mxu0 %v4146_v1 }
  0x43   : > { %3695 = vmatprep.subr.bf16.mxu1 %v4146_v1 }
  0x44   : > { %3678 = vmatmul.mubr.msk.bf16.vlgmr.msra.gmra.mrb[20].mxu0 %vm389_vm1, %v4289_v8 }
  0x45   : > { %3686 = vmatmul.mubr.msk.bf16.vlgmr.msra.gmra.mrb[20].mxu1 %vm389_vm1, %v4289_v8  ;;  %3691 = vmatprep.mubr.msk.bf16.mxu0 %vm4147_vm0, %v4146_v1 }
  0x46   : > { %3697 = vmatprep.mubr.msk.bf16.mxu1 %vm4147_vm0, %v4146_v1 }
  0xef   : > { %v427_v27 = vpop.f32.mrb[0].mxu0  ;;  %v479_v28 = vpop.f32.mrb[0].mxu1 }
  0xf0   : > { %v3599_v29 = vpop.f32.mrb[1].mxu0  ;;  %v3607_v30 = vpop.f32.mrb[1].mxu1  ;;  %v1039_v57 = vpack.c.bf16 %v427_v27, %v427_v27  ;;  %v1040_v58 = vpack.c.bf16 %v479_v28, %v479_v28 }
  0xf1   : > { %v430_v31 = vpop.f32.mrb[2].mxu0  ;;  %v482_v32 = vpop.f32.mrb[2].mxu1 }
  0xf2   : > { %v3600_v33 = vpop.f32.mrb[3].mxu0  ;;  %v3608_v34 = vpop.f32.mrb[3].mxu1 }
  0xf7   : > { %v531_v35 = vpop.f32.mrb[4].mxu0  ;;  %v583_v36 = vpop.f32.mrb[4].mxu1 }
  0xf8   : > { %v3615_v37 = vpop.f32.mrb[5].mxu0  ;;  %v3623_v38 = vpop.f32.mrb[5].mxu1  ;;  %v1041_v6 = vpack.c.bf16 %v531_v35, %v531_v35  ;;  %v1042_v8 = vpack.c.bf16 %v583_v36, %v583_v36 }
  0xf9   : > { %v534_v39 = vpop.f32.mrb[6].mxu0  ;;  %v586_v40 = vpop.f32.mrb[6].mxu1 }
  0xfa   : > { %v3616_v41 = vpop.f32.mrb[7].mxu0  ;;  %v3624_v42 = vpop.f32.mrb[7].mxu1 }
  0xff   : > { %v652_v43 = vpop.f32.mrb[8].mxu0  ;;  %v704_v44 = vpop.f32.mrb[8].mxu1 }
 0x100   : > { %v1043_v45 = vpack.c.bf16 %v652_v43, %v652_v43  ;;  %v1044_v46 = vpack.c.bf16 %v704_v44, %v704_v44  ;;  %v3631_v47 = vpop.f32.mrb[9].mxu0  ;;  %v3639_v48 = vpop.f32.mrb[9].mxu1 }
 0x101   : > { %v655_v49 = vpop.f32.mrb[10].mxu0  ;;  %v707_v50 = vpop.f32.mrb[10].mxu1 }
 0x102   : > { %v1052_v51 = vsel %vm1047_vm2, %v1043_v45, 0  ;;  %v1098_v52 = vsel %vm1047_vm2, %v1044_v46, 0  ;;  %v3632_v53 = vpop.f32.mrb[11].mxu0  ;;  %v3640_v54 = vpop.f32.mrb[11].mxu1 }
 0x103   : > { %3690 = vmatpush3.bf16.xpose.msra.mxu0 %v1052_v51  ;;  %3696 = vmatpush3.bf16.xpose.msra.mxu1 %v1098_v52 }
 0x104   : > { %3701 = vmatprep.subr.bf16.mxu0 %v4146_v1  ;;  %3707 = vmatprep.subr.bf16.mxu1 %v4146_v1 }
 0x107   : > { %v756_v55 = vpop.f32.mrb[12].mxu0  ;;  %v808_v56 = vpop.f32.mrb[12].mxu1 }
 0x108   : > { %v1045_v59 = vpack.c.bf16 %v756_v55, %v756_v55  ;;  %v1046_v60 = vpack.c.bf16 %v808_v56, %v808_v56  ;;  %v3647_v61 = vpop.f32.mrb[13].mxu0  ;;  %v3655_v62 = vpop.f32.mrb[13].mxu1 }
 0x109   : > { %v759_v63 = vpop.f32.mrb[14].mxu0  ;;  %v811_v0 = vpop.f32.mrb[14].mxu1 }
 0x10a   : > { %v1144_v2 = vsel %vm1047_vm2, %v1045_v59, 0  ;;  %v1190_v3 = vsel %vm1047_vm2, %v1046_v60, 0  ;;  %v3648_v4 = vpop.f32.mrb[15].mxu0  ;;  %3692 = vmatmul.mubr.msk.bf16.vlgmr.msra.gmra.mrb[24].mxu0 %vm1047_vm2, %v1039_v57  ;;  %3698 = vmatmul.mubr.msk.bf16.vlgmr.msra.gmra.mrb[24].mxu1 %vm1047_vm2, %v1040_v58  ;;  %v3656_v5 = vpop.f32.mrb[15].mxu1 }
 0x10b   : > { %3702 = vmatpush3.bf16.xpose.msra.mxu0 %v1144_v2  ;;  %3708 = vmatpush3.bf16.xpose.msra.mxu1 %v1190_v3 }
 0x10c   : > { %3703 = vmatprep.mubr.msk.bf16.mxu0 %vm4147_vm0, %v4146_v1  ;;  %3709 = vmatprep.mubr.msk.bf16.mxu1 %vm4147_vm0, %v4146_v1 }
 0x10d   : > { %3713 = vmatprep.subr.bf16.mxu0 %v4146_v1  ;;  %3719 = vmatprep.subr.bf16.mxu1 %v4146_v1 }
 0x10f   : > { %v877_v9 = vpop.f32.mrb[16].mxu0  ;;  %v929_v13 = vpop.f32.mrb[16].mxu1 }
 0x110   : > { %v1280_v10 = vpack.c.bf16 %v877_v9, %v877_v9  ;;  %v3663_v11 = vpop.f32.mrb[17].mxu0  ;;  %v1281_v16 = vpack.c.bf16 %v929_v13, %v929_v13  ;;  %v3671_v17 = vpop.f32.mrb[17].mxu1 }
 0x111   : > { %v880_v12 = vpop.f32.mrb[18].mxu0  ;;  %v932_v18 = vpop.f32.mrb[18].mxu1 }
 0x112   : > { %3704 = vmatmul.mubr.msk.bf16.vlgmr.msra.gmra.mrb[28].mxu0 %vm1047_vm2, %v1041_v6  ;;  %3710 = vmatmul.mubr.msk.bf16.vlgmr.msra.gmra.mrb[28].mxu1 %vm1047_vm2, %v1042_v8  ;;  %v1289_v14 = vsel %vm1287_vm3, %v1280_v10, 0  ;;  %v3664_v15 = vpop.f32.mrb[19].mxu0  ;;  %v1335_v19 = vsel %vm1287_vm3, %v1281_v16, 0  ;;  %v3672_v20 = vpop.f32.mrb[19].mxu1 }
 0x113   : > { %3715 = vmatprep.mubr.msk.bf16.mxu0 %vm4147_vm0, %v4146_v1  ;;  %3721 = vmatprep.mubr.msk.bf16.mxu1 %vm4147_vm0, %v4146_v1 }
 0x114   : > { %3714 = vmatpush3.bf16.msra.mxu0 %v1289_v14  ;;  %3720 = vmatpush3.bf16.msra.mxu1 %v1335_v19 }
 0x115   : > { %3725 = vmatprep.subr.bf16.mxu0 %v4146_v1  ;;  %3731 = vmatprep.subr.bf16.mxu1 %v4146_v1 }
 0x117   : > { %v4437_v21 = vpop.f32.mrb[20].mxu0 }
 0x118   : > { %v4439_v22 = vpop.f32.mrb[20].mxu1  ;;  %v3679_v23 = vpop.f32.mrb[21].mxu0  ;;  %v1282_v11 = vpack.c.bf16 %v4437_v21, %v4437_v21  ;;  %v356_v21 = vld [vmem:[%s4844_s3] sm:$0xf] }
 0x119   : > { %v3687_v24 = vpop.f32.mrb[21].mxu1  ;;  %v984_v25 = vpop.f32.mrb[22].mxu0  ;;  %v1283_v17 = vpack.c.bf16 %v4439_v22, %v4439_v22 }
 0x11a   : > { %v1036_v26 = vpop.f32.mrb[22].mxu1  ;;  %v3680_v27 = vpop.f32.mrb[23].mxu0  ;;  %v1381_v16 = vsel %vm1287_vm3, %v1282_v11, 0  ;;  %v1477_v25 = vsel %vm1287_vm3, %v356_v21, 0 }
 0x11b   : > { %v3688_v28 = vpop.f32.mrb[23].mxu1  ;;  %v1427_v23 = vsel %vm1287_vm3, %v1283_v17, 0 }
 0x1dd   : > { %v1088_v29 = vpop.f32.mrb[24].mxu0  ;;  %v1134_v30 = vpop.f32.mrb[24].mxu1 }
 0x1de   : > { %v3693_v31 = vpop.f32.mrb[25].mxu0  ;;  %v3699_v32 = vpop.f32.mrb[25].mxu1  ;;  %v1232_v33 = vsel %vm1047_vm2, %v1088_v29, -inf  ;;  %v1235_v38 = vsel %vm1047_vm2, %v1134_v30, -inf }
 0x1df   : > { %v1137_v34 = vpop.f32.mrb[26].mxu1  ;;  %1233 = vmax.xlane.f32.xlu0 %v1232_v33  ;;  %v1091_v35 = vpop.f32.mrb[26].mxu0  ;;  %v358_v31 = vld [vmem:[%s4844_s3 + $0x8] sm:$0xf] }
 0x1e0   : > { %v3694_v36 = vpop.f32.mrb[27].mxu0  ;;  %v3700_v37 = vpop.f32.mrb[27].mxu1  ;;  %v1569_v35 = vsel %vm1287_vm3, %v358_v31, 0 }
 0x1e1   : > { %v359_v37 = vld [vmem:[%s4844_s3 + $0xc] sm:$0xf] }
 0x1e3   : > { %1236 = vmax.xlane.f32.xlu0 %v1235_v38 }
 0x1e5   : > { %v1180_v39 = vpop.f32.mrb[28].mxu0  ;;  %v1226_v40 = vpop.f32.mrb[28].mxu1 }
 0x1e6   : > { %v3705_v41 = vpop.f32.mrb[29].mxu0  ;;  %v3711_v42 = vpop.f32.mrb[29].mxu1  ;;  %v1238_v43 = vsel %vm1047_vm2, %v1180_v39, -inf  ;;  %v1241_v48 = vsel %vm1047_vm2, %v1226_v40, -inf }
 0x1e7   : > { %v1229_v44 = vpop.f32.mrb[30].mxu1  ;;  %1239 = vmax.xlane.f32.xlu1 %v1238_v43  ;;  %v1183_v45 = vpop.f32.mrb[30].mxu0  ;;  %v1615_v42 = vsel %vm1287_vm3, %v359_v37, 0 }
 0x1e8   : > { %v3706_v46 = vpop.f32.mrb[31].mxu0  ;;  %v3712_v47 = vpop.f32.mrb[31].mxu1 }
 0x1eb   : > { %1242 = vmax.xlane.f32.xlu1 %v1241_v48 }
 0x26c   : > { %v1234_v49 = vpop.xlane.xlu0 %1233 }
 0x26d   : > { %v1244_v50 = vsub.f32 %v1088_v29, %v1234_v49  ;;  %v357_v29 = vld [vmem:[%s4844_s3 + $0x4] sm:$0xf] }
 0x26f   : > { %v1248_v51 = vmul.f32 1.442695, %v1244_v50 }
 0x270   : > { %v1237_v52 = vpop.xlane.xlu0 %1236 }
 0x271   : > { %4044 = vpow2.f32 %v1248_v51  ;;  %v1245_v53 = vsub.f32 %v1134_v30, %v1237_v52  ;;  %v1523_v30 = vsel %vm1287_vm3, %v357_v29, 0 }
 0x273   : > { %v1250_v54 = vmul.f32 1.442695, %v1245_v53 }
 0x274   : > { %v1240_v55 = vpop.xlane.xlu1 %1239 }
 0x275   : > { %4046 = vpow2.f32 %v1250_v54  ;;  %v1246_v56 = vsub.f32 %v1180_v39, %v1240_v55 }
 0x277   : > { %v1252_v57 = vmul.f32 1.442695, %v1246_v56 }
 0x278   : > { %v1243_v58 = vpop.xlane.xlu1 %1242 }
 0x279   : > { %4048 = vpow2.f32 %v1252_v57  ;;  %v1247_v59 = vsub.f32 %v1226_v40, %v1243_v58 }
 0x27b   : > { %v4045_v60 = vpop.eup %4044  ;;  %v1254_v61 = vmul.f32 1.442695, %v1247_v59 }
 0x27c   : > { %v1256_v62 = vsel %vm1047_vm2, %v4045_v60, 0.0 }
 0x27d   : > { %4050 = vpow2.f32 %v1254_v61  ;;  %1257 = vadd.xlane.f32.xlu0 %v1256_v62 }
 0x27f   : > { %v4047_v63 = vpop.eup %4046 }
 0x280   : > { %v1259_v0 = vsel %vm1047_vm2, %v4047_v63, 0.0 }
 0x281   : > { %1260 = vadd.xlane.f32.xlu1 %v1259_v0 }
 0x283   : > { %v4049_v2 = vpop.eup %4048 }
 0x284   : > { %v1262_v3 = vsel %vm1047_vm2, %v4049_v2, 0.0 }
 0x285   : > { %1263 = vadd.xlane.f32.xlu0 %v1262_v3 }
 0x287   : > { %v4051_v4 = vpop.eup %4050 }
 0x288   : > { %v1265_v5 = vsel %vm1047_vm2, %v4051_v4, 0.0 }
 0x289   : > { %1266 = vadd.xlane.f32.xlu1 %v1265_v5 }
 0x30a   : > { %v1258_v6 = vpop.xlane.xlu0 %1257 }
 0x30b   : > { %4052 = vrcp.f32 %v1258_v6 }
 0x30e   : > { %v1261_v8 = vpop.xlane.xlu1 %1260 }
 0x30f   : > { %4054 = vrcp.f32 %v1261_v8 }
 0x312   : > { %v1264_v9 = vpop.xlane.xlu0 %1263 }
 0x313   : > { %4056 = vrcp.f32 %v1264_v9 }
 0x315   : > { %v4053_v10 = vpop.eup %4052 }
 0x316   : > { %v1272_v12 = vmul.f32 %v4053_v10, %v4045_v60  ;;  %v1267_v13 = vpop.xlane.xlu1 %1266 }
 0x317   : > { %4058 = vrcp.f32 %v1267_v13 }
 0x318   : > { %v1276_v14 = vpack.c.bf16 %v1272_v12, %v1272_v12 }
 0x319   : > { %v4055_v15 = vpop.eup %4054 }
 0x31a   : > { %v1273_v18 = vmul.f32 %v4055_v15, %v4047_v63  ;;  %3716 = vmatmul.mubr.msk.bf16.vlgmr.msra.gmra.mrb[32].mxu0 %vm1047_vm2, %v1276_v14 }
 0x31b   : > { %3726 = vmatpush3.bf16.msra.mxu0 %v1381_v16  ;;  %3727 = vmatprep.mubr.msk.bf16.mxu0 %vm4147_vm0, %v4146_v1 }
 0x31c   : > { %v1277_v19 = vpack.c.bf16 %v1273_v18, %v1273_v18  ;;  %3737 = vmatprep.subr.bf16.mxu0 %v4146_v1 }
 0x31d   : > { %v4057_v20 = vpop.eup %4056 }
 0x31e   : > { %v1274_v24 = vmul.f32 %v4057_v20, %v4049_v2  ;;  %3722 = vmatmul.mubr.msk.bf16.vlgmr.msra.gmra.mrb[32].mxu1 %vm1047_vm2, %v1277_v19 }
 0x31f   : > { %3732 = vmatpush3.bf16.msra.mxu1 %v1427_v23  ;;  %3733 = vmatprep.mubr.msk.bf16.mxu1 %vm4147_vm0, %v4146_v1 }
 0x320   : > { %v1278_v22 = vpack.c.bf16 %v1274_v24, %v1274_v24  ;;  %3743 = vmatprep.subr.bf16.mxu1 %v4146_v1  ;;  %v4014_v24 = vld [vmem:[%s4845_s4] sm:$0xff]  }
 0x321   : > { %v4059_v26 = vpop.eup %4058 }
 0x322   : > { %v1275_v27 = vmul.f32 %v4059_v26, %v4051_v4  ;;  %3728 = vmatmul.mubr.msk.bf16.vlgmr.msra.gmra.mrb[36].mxu0 %vm1047_vm2, %v1278_v22  ;;  %v4015_v22 = vld [vmem:[%s4845_s4 + $0x10] sm:$0xff]  }
 0x323   : > { %3738 = vmatpush3.bf16.msra.mxu0 %v1477_v25  ;;  %3739 = vmatprep.mubr.msk.bf16.mxu0 %vm4147_vm0, %v4146_v1  ;;  %v4017_v25 = vld [vmem:[%s4845_s4 + $0x18] sm:$0xff]  }
 0x324   : > { %v1279_v28 = vpack.c.bf16 %v1275_v27, %v1275_v27  ;;  %3749 = vmatprep.subr.bf16.mxu0 %v4146_v1 }
 0x326   : > { %3734 = vmatmul.mubr.msk.bf16.vlgmr.msra.gmra.mrb[36].mxu1 %vm1047_vm2, %v1279_v28 }
 0x327   : > { %3745 = vmatprep.mubr.msk.bf16.mxu1 %vm4147_vm0, %v4146_v1  ;;  %3744 = vmatpush3.bf16.msra.mxu1 %v1523_v30  ;;  %v3365_v30 = vld [vmem:[%s4849_s8] ss:$0 sm:$0xff] }
 0x328   : > { %3755 = vmatprep.subr.bf16.mxu1 %v4146_v1 }
 0x3ed   : > { %v1325_v32 = vpop.f32.mrb[32].mxu0 }
 0x3ee   : > { %v1469_v33 = vpack.c.bf16 %v1325_v32, %v1325_v32  ;;  %v3717_v34 = vpop.f32.mrb[33].mxu0  ;;  %v3366_v32 = vld [vmem:[%s4849_s8 + $0x1] ss:$0 sm:$0xff] }
 0x3ef   : > { %v1328_v36 = vpop.f32.mrb[34].mxu0 }
 0x3f0   : > { %v3718_v38 = vpop.f32.mrb[35].mxu0  ;;  %3740 = vmatmul.mubr.msk.bf16.vlgmr.msra.gmra.mrb[40].mxu0 %vm1047_vm2, %v1469_v33  ;;  %v4019_v36 = vld [vmem:[%s4845_s4 + $0x30] sm:$0xff]  }
 0x3f1   : > { %v1371_v39 = vpop.f32.mrb[32].mxu1  ;;  %3750 = vmatpush3.bf16.msra.mxu0 %v1569_v35  ;;  %3751 = vmatprep.mubr.msk.bf16.mxu0 %vm4147_vm0, %v4146_v1  ;;  %v4018_v35 = vld [vmem:[%s4845_s4 + $0x20] sm:$0xff]   ;;  %v4020_v38 = vld [vmem:[%s4845_s4 + $0x28] sm:$0xff]  }
 0x3f2   : > { %v1470_v40 = vpack.c.bf16 %v1371_v39, %v1371_v39  ;;  %v3723_v41 = vpop.f32.mrb[33].mxu1  ;;  %3761 = vmatprep.subr.bf16.mxu0 %v4146_v1  ;;  %v4021_v39 = vld [vmem:[%s4845_s4 + $0x38] sm:$0xff]  }
 0x3f3   : > { %v1374_v43 = vpop.f32.mrb[34].mxu1  ;;  %v4023_v41 = vld [vmem:[%s4845_s4 + $0x50] sm:$0xff]  }
 0x3f4   : > { %v3724_v44 = vpop.f32.mrb[35].mxu1  ;;  %3746 = vmatmul.mubr.msk.bf16.vlgmr.msra.gmra.mrb[40].mxu1 %vm1047_vm2, %v1470_v40  ;;  %v4022_v40 = vld [vmem:[%s4845_s4 + $0x40] sm:$0xff]   ;;  %v4025_v43 = vld [vmem:[%s4845_s4 + $0x58] sm:$0xff]  }
 0x3f5   : > { %v1417_v45 = vpop.f32.mrb[36].mxu0  ;;  %3756 = vmatpush3.bf16.msra.mxu1 %v1615_v42  ;;  %3757 = vmatprep.mubr.msk.bf16.mxu1 %vm4147_vm0, %v4146_v1  ;;  %v4024_v42 = vld [vmem:[%s4845_s4 + $0x48] sm:$0xff]   ;;  %v347_v44 = vld [vmem:[%s344_s26] sm:$0xff]  ;;  %s4082_s26 = scalar_lea.vmem %s4800_s29, 128 }
 0x3f6   : > { %v1471_v46 = vpack.c.bf16 %v1417_v45, %v1417_v45  ;;  %v3729_v47 = vpop.f32.mrb[37].mxu0  ;;  %3769 = vmatprep.subr.bf16.mxu1 %v4146_v1  ;;  %v1694_v45 = vpack.c.bf16 %v347_v44, %v347_v44  ;;  %p4083_p11 = scmp.ne.s32.totalorder %s4800_s29, %s4082_s26  ;;  %p4090_p1 = scmp.lt.s32.totalorder %s4088_s27, %s4082_s26 }
 0x3f7   : > { %v1420_v48 = vpop.f32.mrb[38].mxu0  ;;  %v4027_v47 = vld [vmem:[%s4845_s4 + $0x70] sm:$0xff]  }
 0x3f8   : > { %v3730_v49 = vpop.f32.mrb[39].mxu0  ;;  %3752 = vmatmul.mubr.msk.bf16.vlgmr.msra.gmra.mrb[44].mxu0 %vm1047_vm2, %v1471_v46  ;;  %v4026_v46 = vld [vmem:[%s4845_s4 + $0x60] sm:$0xff]   ;;  %v4028_v48 = vld [vmem:[%s4845_s4 + $0x68] sm:$0xff]   ;;  %p4084_p12 = pnand %p4083_p11, %p4237_p5  ;;  %p4091_p2 = por %p4090_p1, %p4089_p0 }
 0x3f9   : > { %v1463_v50 = vpop.f32.mrb[36].mxu1  ;;  %3765 = vmatprep.mubr.msk.bf16.mxu0 %vm4147_vm0, %v4146_v1  ;;  %3762 = vmatpush3.bf16.msra.mxu0 %v4014_v24  ;;  %v4029_v49 = vld [vmem:[%s4845_s4 + $0x78] sm:$0xff]  }
 0x3fa   : > { %v1472_v51 = vpack.c.bf16 %v1463_v50, %v1463_v50  ;;  %v3735_v52 = vpop.f32.mrb[37].mxu1  ;;  %3763 = vmatprep.subr.bf16.mxu0 %v4146_v1  ;;  %v4030_v50 = vld [vmem:[%s4845_s4 + $0x80] sm:$0xff]   ;;  %p4085_p13 = pneg %p4084_p12 }
 0x3fb   : > { %v1466_v53 = vpop.f32.mrb[38].mxu1  ;;  %v4032_v52 = vld [vmem:[%s4845_s4 + $0x88] sm:$0xff]  }
 0x3fc   : > { %v3736_v54 = vpop.f32.mrb[39].mxu1  ;;  %3758 = vmatmul.mubr.msk.bf16.vlgmr.msra.gmra.mrb[44].mxu1 %vm1047_vm2, %v1472_v51  ;;  %v4031_v51 = vld [vmem:[%s4845_s4 + $0x90] sm:$0xff]   ;;  %v4033_v53 = vld [vmem:[%s4845_s4 + $0x98] sm:$0xff]   ;;  %p4092_p3 = pnand %p4091_p2, %p4085_p13 }
 0x3fd   : > { %3773 = vmatprep.mubr.msk.bf16.mxu1 %vm4147_vm0, %v4146_v1  ;;  %3770 = vmatpush3.bf16.msra.mxu1 %v4015_v22  ;;  %v4034_v54 = vld [vmem:[%s4845_s4 + $0xa0] sm:$0xff]  }
 0x3fe   : > { %3771 = vmatprep.subr.bf16.mxu1 %v4146_v1 }
 0x401   : > { %3772 = vmatpush3.bf16.msra.mxu1 %v4017_v25 }
 0x402   : > { %3785 = vmatprep.subr.bf16.mxu1 %v4146_v1 }
 0x4c3   : > { %v1513_v55 = vpop.f32.mrb[40].mxu0 }
 0x4c4   : > { %v3741_v56 = vpop.f32.mrb[41].mxu0  ;;  %v1657_v60 = vsel %vm389_vm1, %v1513_v55, 0.0  ;;  %v4035_v55 = vld [vmem:[%s4845_s4 + $0xb0] sm:$0xff]  }
 0x4c5   : > { %v1516_v57 = vpop.f32.mrb[42].mxu0  ;;  %v4036_v56 = vld [vmem:[%s4845_s4 + $0xa8] sm:$0xff]  }
 0x4c6   : > { %v3742_v58 = vpop.f32.mrb[43].mxu0  ;;  %v4037_v57 = vld [vmem:[%s4845_s4 + $0xb8] sm:$0xff]  }
 0x4c7   : > { %v1559_v59 = vpop.f32.mrb[40].mxu1 }
 0x4c8   : > { %v1658_v61 = vsel %vm389_vm1, %v1559_v59, 0.0  ;;  %v3747_v62 = vpop.f32.mrb[41].mxu1 }
 0x4c9   : > { %v1659_v63 = vadd.f32 %v1658_v61, %v1657_v60  ;;  %v1562_v0 = vpop.f32.mrb[42].mxu1 }
 0x4ca   : > { %v3748_v2 = vpop.f32.mrb[43].mxu1 }
 0x4cb   : > { %v1605_v3 = vpop.f32.mrb[44].mxu0 }
 0x4cc   : > { %v1660_v4 = vsel %vm389_vm1, %v1605_v3, 0.0  ;;  %v3753_v5 = vpop.f32.mrb[45].mxu0 }
 0x4cd   : > { %v1661_v6 = vadd.f32 %v1660_v4, %v1659_v63  ;;  %v1608_v8 = vpop.f32.mrb[46].mxu0 }
 0x4ce   : > { %v3754_v9 = vpop.f32.mrb[47].mxu0 }
 0x4cf   : > { %v1651_v10 = vpop.f32.mrb[44].mxu1 }
 0x4d0   : > { %v1662_v11 = vsel %vm389_vm1, %v1651_v10, 0.0  ;;  %v3759_v12 = vpop.f32.mrb[45].mxu1 }
 0x4d1   : > { %v1663_v13 = vadd.f32 %v1662_v11, %v1661_v6  ;;  %v1654_v14 = vpop.f32.mrb[46].mxu1 }
 0x4d2   : > { %v3760_v15 = vpop.f32.mrb[47].mxu1 }
 0x4d3   : > { %v1664_v16 = vadd.f32 %v1663_v13, %v4284_v7  ;;  %v4016_v7 = vld [vmem:[%s4845_s4 + $0x8] sm:$0xff]  }
 0x4d4   : > { %3764 = vmatpush3.bf16.msra.mxu0 %v4016_v7 }
 0x4d5   : > { %v1665_v17 = vsel %vm389_vm1, %v1664_v16, 0.0  ;;  %3777 = vmatprep.subr.bf16.mxu0 %v4146_v1 }
 0x4d6   : > { %1666 = vadd.xlane.f32.xlu0 %v1665_v17 }
 0x563   : > { %v1667_v18 = vpop.xlane.xlu0 %1666 }
 0x564   : > { %v1669_v19 = vmul.f32 0.03125, %v1667_v18 }
 0x566   : > { %v1670_v20 = vsub.f32 %v1664_v16, %v1669_v19 }
 0x568   : > { %v1671_v21 = vmul.f32 %v1670_v20, %v1670_v20 }
 0x56a   : > { %v1672_v23 = vsel %vm389_vm1, %v1671_v21, 0.0 }
 0x56b   : > { %1673 = vadd.xlane.f32.xlu1 %v1672_v23 }
 0x5f8   : > { %v1674_v26 = vpop.xlane.xlu1 %1673 }
 0x5f9   : > { %v1675_v27 = vmul.f32 0.03125, %v1674_v26 }
 0x5fb   : > { %v1676_v28 = vadd.f32 1e-05, %v1675_v27 }
 0x5fd   : > { %4060 = vrsqrt.f32 %v1676_v28 }
 0x607   : > { %v4061_v29 = vpop.eup %4060 }
 0x608   : > { %v1678_v31 = vmul.f32 %v4061_v29, %v1670_v20 }
 0x60a   : > { %v1683_v33 = vmul.f32 %v3365_v30, %v1678_v31 }
 0x60c   : > { %v4530_v34 = vadd.f32 %v3366_v32, %v1683_v33 }
 0x60e   : > { %v1693_v37 = vpack.c.bf16 %v4530_v34, %v4530_v34 }
 0x610   : > { %3766 = vmatmul.mubr.msk.bf16.vlgmr.msra.gmra.mrb[48].mxu0 %vm389_vm1, %v1693_v37  ;;  %3774 = vmatmul.mubr.msk.bf16.vlgmr.msra.gmra.mrb[48].mxu1 %vm389_vm1, %v1693_v37 }
 0x611   : > { %3778 = vmatpush3.bf16.msra.mxu0 %v4018_v35  ;;  %3786 = vmatpush3.bf16.msra.mxu1 %v4019_v36 }
 0x612   : > { %3779 = vmatprep.subr.bf16.mxu0 %v4146_v1  ;;  %3787 = vmatprep.subr.bf16.mxu1 %v4146_v1 }
 0x613   : > { %3781 = vmatprep.mubr.msk.bf16.mxu0 %vm4147_vm0, %v4146_v1  ;;  %3789 = vmatprep.mubr.msk.bf16.mxu1 %vm4147_vm0, %v4146_v1 }
 0x615   : > { %3780 = vmatpush3.bf16.msra.mxu0 %v4020_v38  ;;  %3788 = vmatpush3.bf16.msra.mxu1 %v4021_v39 }
 0x616   : > { %3793 = vmatprep.subr.bf16.mxu0 %v4146_v1  ;;  %3801 = vmatprep.subr.bf16.mxu1 %v4146_v1 }
 0x618   : > { %3782 = vmatmul.mubr.msk.bf16.vlgmr.msra.gmra.mrb[52].mxu0 %vm389_vm1, %v1693_v37  ;;  %3790 = vmatmul.mubr.msk.bf16.vlgmr.msra.gmra.mrb[52].mxu1 %vm389_vm1, %v1693_v37 }
 0x619   : > { %3794 = vmatpush3.bf16.msra.mxu0 %v4022_v40  ;;  %3802 = vmatpush3.bf16.msra.mxu1 %v4023_v41 }
 0x61a   : > { %3795 = vmatprep.subr.bf16.mxu0 %v4146_v1  ;;  %3803 = vmatprep.subr.bf16.mxu1 %v4146_v1 }
 0x61b   : > { %3797 = vmatprep.mubr.msk.bf16.mxu0 %vm4147_vm0, %v4146_v1  ;;  %3805 = vmatprep.mubr.msk.bf16.mxu1 %vm4147_vm0, %v4146_v1 }
 0x61d   : > { %3796 = vmatpush3.bf16.msra.mxu0 %v4024_v42  ;;  %3804 = vmatpush3.bf16.msra.mxu1 %v4025_v43 }
 0x61e   : > { %3809 = vmatprep.subr.bf16.mxu0 %v4146_v1  ;;  %3817 = vmatprep.subr.bf16.mxu1 %v4146_v1 }
 0x620   : > { %3798 = vmatmul.mubr.msk.bf16.vlgmr.msra.gmra.mrb[56].mxu0 %vm389_vm1, %v1694_v45  ;;  %3806 = vmatmul.mubr.msk.bf16.vlgmr.msra.gmra.mrb[56].mxu1 %vm389_vm1, %v1694_v45 }
 0x621   : > { %3810 = vmatpush3.bf16.msra.mxu0 %v4026_v46  ;;  %3818 = vmatpush3.bf16.msra.mxu1 %v4027_v47 }
 0x622   : > { %3811 = vmatprep.subr.bf16.mxu0 %v4146_v1  ;;  %3819 = vmatprep.subr.bf16.mxu1 %v4146_v1 }
 0x623   : > { %3813 = vmatprep.mubr.msk.bf16.mxu0 %vm4147_vm0, %v4146_v1  ;;  %3821 = vmatprep.mubr.msk.bf16.mxu1 %vm4147_vm0, %v4146_v1 }
 0x625   : > { %3812 = vmatpush3.bf16.msra.mxu0 %v4028_v48  ;;  %3820 = vmatpush3.bf16.msra.mxu1 %v4029_v49 }
 0x626   : > { %3825 = vmatprep.subr.bf16.mxu0 %v4146_v1  ;;  %3833 = vmatprep.subr.bf16.mxu1 %v4146_v1 }
 0x628   : > { %3814 = vmatmul.mubr.msk.bf16.vlgmr.msra.gmra.mrb[60].mxu0 %vm389_vm1, %v1694_v45  ;;  %3822 = vmatmul.mubr.msk.bf16.vlgmr.msra.gmra.mrb[60].mxu1 %vm389_vm1, %v1694_v45 }
 0x629   : > { %3826 = vmatpush3.bf16.msra.mxu0 %v4030_v50  ;;  %3834 = vmatpush3.bf16.msra.mxu1 %v4031_v51 }
 0x62a   : > { %3827 = vmatprep.subr.bf16.mxu0 %v4146_v1  ;;  %3835 = vmatprep.subr.bf16.mxu1 %v4146_v1 }
 0x62b   : > { %3829 = vmatprep.mubr.msk.bf16.mxu0 %vm4147_vm0, %v4146_v1  ;;  %3837 = vmatprep.mubr.msk.bf16.mxu1 %vm4147_vm0, %v4146_v1 }
 0x62d   : > { %3828 = vmatpush3.bf16.msra.mxu0 %v4032_v52  ;;  %3836 = vmatpush3.bf16.msra.mxu1 %v4033_v53 }
 0x62e   : > { %3841 = vmatprep.subr.bf16.mxu0 %v4146_v1  ;;  %3849 = vmatprep.subr.bf16.mxu1 %v4146_v1 }
 0x630   : > { %3830 = vmatmul.mubr.msk.bf16.vlgmr.msra.gmra.mrb[64].mxu0 %vm389_vm1, %v1694_v45  ;;  %3838 = vmatmul.mubr.msk.bf16.vlgmr.msra.gmra.mrb[64].mxu1 %vm389_vm1, %v1694_v45 }
 0x631   : > { %3842 = vmatpush3.bf16.msra.mxu0 %v4034_v54  ;;  %3845 = vmatprep.mubr.msk.bf16.mxu0 %vm4147_vm0, %v4146_v1 }
 0x632   : > { %3843 = vmatprep.subr.bf16.mxu0 %v4146_v1  ;;  %3850 = vmatpush3.bf16.msra.mxu1 %v4035_v55 }
 0x633   : > { %3853 = vmatprep.mubr.msk.bf16.mxu1 %vm4147_vm0, %v4146_v1  ;;  %3851 = vmatprep.subr.bf16.mxu1 %v4146_v1 }
 0x635   : > { %3844 = vmatpush3.bf16.msra.mxu0 %v4036_v56 }
 0x636   : > { %3852 = vmatpush3.bf16.msra.mxu1 %v4037_v57  ;;  %3857 = vmatprep.subr.bf16.mxu0 %v4146_v1 }
 0x637   : > { %3863 = vmatprep.subr.bf16.mxu1 %v4146_v1 }
 0x638   : > { %3846 = vmatmul.mubr.msk.bf16.vlgmr.msra.gmra.mrb[68].mxu0 %vm389_vm1, %v1694_v45 }
 0x639   : > { %3854 = vmatmul.mubr.msk.bf16.vlgmr.msra.gmra.mrb[68].mxu1 %vm389_vm1, %v1694_v45  ;;  %3859 = vmatprep.mubr.msk.bf16.mxu0 %vm4147_vm0, %v4146_v1 }
 0x63a   : > { %3865 = vmatprep.mubr.msk.bf16.mxu1 %vm4147_vm0, %v4146_v1 }
 0x6e3   : > { %v1760_v58 = vpop.f32.mrb[48].mxu0  ;;  %v1812_v59 = vpop.f32.mrb[48].mxu1 }
 0x6e4   : > { %v3767_v60 = vpop.f32.mrb[49].mxu0  ;;  %v3775_v61 = vpop.f32.mrb[49].mxu1  ;;  %v2375_v25 = vpack.c.bf16 %v1760_v58, %v1760_v58  ;;  %v2376_v26 = vpack.c.bf16 %v1812_v59, %v1812_v59 }
 0x6e5   : > { %v1763_v62 = vpop.f32.mrb[50].mxu0  ;;  %v1815_v63 = vpop.f32.mrb[50].mxu1 }
 0x6e6   : > { %v3768_v0 = vpop.f32.mrb[51].mxu0  ;;  %v3776_v2 = vpop.f32.mrb[51].mxu1 }
 0x6eb   : > { %v1864_v3 = vpop.f32.mrb[52].mxu0  ;;  %v1916_v4 = vpop.f32.mrb[52].mxu1 }
 0x6ec   : > { %v3783_v5 = vpop.f32.mrb[53].mxu0  ;;  %v3791_v6 = vpop.f32.mrb[53].mxu1  ;;  %v2377_v38 = vpack.c.bf16 %v1864_v3, %v1864_v3  ;;  %v2378_v39 = vpack.c.bf16 %v1916_v4, %v1916_v4 }
 0x6ed   : > { %v1867_v8 = vpop.f32.mrb[54].mxu0  ;;  %v1919_v9 = vpop.f32.mrb[54].mxu1 }
 0x6ee   : > { %v3784_v10 = vpop.f32.mrb[55].mxu0  ;;  %v3792_v11 = vpop.f32.mrb[55].mxu1 }
 0x6f3   : > { %v1988_v12 = vpop.f32.mrb[56].mxu0  ;;  %v2040_v13 = vpop.f32.mrb[56].mxu1 }
 0x6f4   : > { %v2379_v14 = vpack.c.bf16 %v1988_v12, %v1988_v12  ;;  %v2380_v15 = vpack.c.bf16 %v2040_v13, %v2040_v13  ;;  %v3799_v16 = vpop.f32.mrb[57].mxu0  ;;  %v3807_v17 = vpop.f32.mrb[57].mxu1 }
 0x6f5   : > { %v1991_v18 = vpop.f32.mrb[58].mxu0  ;;  %v2043_v19 = vpop.f32.mrb[58].mxu1 }
 0x6f6   : > { %v2387_v20 = vsel %vm1047_vm2, %v2379_v14, 0  ;;  %v2433_v21 = vsel %vm1047_vm2, %v2380_v15, 0  ;;  %v3800_v23 = vpop.f32.mrb[59].mxu0  ;;  %v3808_v24 = vpop.f32.mrb[59].mxu1 }
 0x6f7   : > { %3858 = vmatpush3.bf16.xpose.msra.mxu0 %v2387_v20  ;;  %3864 = vmatpush3.bf16.xpose.msra.mxu1 %v2433_v21 }
 0x6f8   : > { %3869 = vmatprep.subr.bf16.mxu0 %v4146_v1  ;;  %3875 = vmatprep.subr.bf16.mxu1 %v4146_v1 }
 0x6fb   : > { %v2092_v22 = vpop.f32.mrb[60].mxu0  ;;  %v2144_v7 = vpop.f32.mrb[60].mxu1 }
 0x6fc   : > { %v2381_v27 = vpack.c.bf16 %v2092_v22, %v2092_v22  ;;  %v2382_v28 = vpack.c.bf16 %v2144_v7, %v2144_v7  ;;  %v3815_v29 = vpop.f32.mrb[61].mxu0  ;;  %v3823_v30 = vpop.f32.mrb[61].mxu1 }
 0x6fd   : > { %v2095_v31 = vpop.f32.mrb[62].mxu0  ;;  %v2147_v32 = vpop.f32.mrb[62].mxu1 }
 0x6fe   : > { %v2479_v33 = vsel %vm1047_vm2, %v2381_v27, 0  ;;  %v2525_v35 = vsel %vm1047_vm2, %v2382_v28, 0  ;;  %v3816_v36 = vpop.f32.mrb[63].mxu0  ;;  %v3824_v37 = vpop.f32.mrb[63].mxu1  ;;  %3860 = vmatmul.mubr.msk.bf16.vlgmr.msra.gmra.mrb[72].mxu0 %vm1047_vm2, %v2375_v25  ;;  %3866 = vmatmul.mubr.msk.bf16.vlgmr.msra.gmra.mrb[72].mxu1 %vm1047_vm2, %v2376_v26 }
 0x6ff   : > { %3870 = vmatpush3.bf16.xpose.msra.mxu0 %v2479_v33  ;;  %3876 = vmatpush3.bf16.xpose.msra.mxu1 %v2525_v35 }
 0x700   : > { %3871 = vmatprep.mubr.msk.bf16.mxu0 %vm4147_vm0, %v4146_v1  ;;  %3877 = vmatprep.mubr.msk.bf16.mxu1 %vm4147_vm0, %v4146_v1 }
 0x701   : > { %3881 = vmatprep.subr.bf16.mxu0 %v4146_v1  ;;  %3887 = vmatprep.subr.bf16.mxu1 %v4146_v1 }
 0x703   : > { %v2213_v40 = vpop.f32.mrb[64].mxu0  ;;  %v2265_v44 = vpop.f32.mrb[64].mxu1 }
 0x704   : > { %v2615_v41 = vpack.c.bf16 %v2213_v40, %v2213_v40  ;;  %v3831_v42 = vpop.f32.mrb[65].mxu0  ;;  %v2616_v46 = vpack.c.bf16 %v2265_v44, %v2265_v44  ;;  %v3839_v48 = vpop.f32.mrb[65].mxu1 }
 0x705   : > { %v2216_v43 = vpop.f32.mrb[66].mxu0  ;;  %v2268_v49 = vpop.f32.mrb[66].mxu1 }
 0x706   : > { %3872 = vmatmul.mubr.msk.bf16.vlgmr.msra.gmra.mrb[76].mxu0 %vm1047_vm2, %v2377_v38  ;;  %3878 = vmatmul.mubr.msk.bf16.vlgmr.msra.gmra.mrb[76].mxu1 %vm1047_vm2, %v2378_v39  ;;  %v2623_v45 = vsel %vm1287_vm3, %v2615_v41, 0  ;;  %v3832_v47 = vpop.f32.mrb[67].mxu0  ;;  %v2669_v50 = vsel %vm1287_vm3, %v2616_v46, 0  ;;  %v3840_v51 = vpop.f32.mrb[67].mxu1 }
 0x707   : > { %3883 = vmatprep.mubr.msk.bf16.mxu0 %vm4147_vm0, %v4146_v1  ;;  %3889 = vmatprep.mubr.msk.bf16.mxu1 %vm4147_vm0, %v4146_v1 }
 0x708   : > { %3882 = vmatpush3.bf16.msra.mxu0 %v2623_v45  ;;  %3888 = vmatpush3.bf16.msra.mxu1 %v2669_v50 }
 0x709   : > { %3893 = vmatprep.subr.bf16.mxu0 %v4146_v1  ;;  %3899 = vmatprep.subr.bf16.mxu1 %v4146_v1 }
 0x70b   : > { %v4679_v52 = vpop.f32.mrb[68].mxu0 }
 0x70c   : > { %v4681_v53 = vpop.f32.mrb[68].mxu1  ;;  %v3847_v54 = vpop.f32.mrb[69].mxu0  ;;  %v2617_v46 = vpack.c.bf16 %v4679_v52, %v4679_v52  ;;  %v1690_v52 = vld [vmem:[%s4846_s5 + $0x4] sm:$0xf] }
 0x70d   : > { %v3855_v55 = vpop.f32.mrb[69].mxu1  ;;  %v2320_v56 = vpop.f32.mrb[70].mxu0  ;;  %v2618_v44 = vpack.c.bf16 %v4681_v53, %v4681_v53 }
 0x70e   : > { %v2372_v57 = vpop.f32.mrb[70].mxu1  ;;  %v3848_v58 = vpop.f32.mrb[71].mxu0  ;;  %v2715_v51 = vsel %vm1287_vm3, %v2617_v46, 0  ;;  %v1689_v56 = vld [vmem:[%s4846_s5] sm:$0xf] }
 0x70f   : > { %v3856_v59 = vpop.f32.mrb[71].mxu1  ;;  %v2761_v50 = vsel %vm1287_vm3, %v2618_v44, 0 }
 0x710   : > { %v2857_v59 = vsel %vm1287_vm3, %v1690_v52, 0 }
 0x7d1   : > { %v2423_v60 = vpop.f32.mrb[72].mxu0  ;;  %v2469_v61 = vpop.f32.mrb[72].mxu1 }
 0x7d2   : > { %v3861_v62 = vpop.f32.mrb[73].mxu0  ;;  %v3867_v63 = vpop.f32.mrb[73].mxu1  ;;  %v2570_v0 = vsel %vm1047_vm2, %v2469_v61, -inf  ;;  %v2567_v2 = vsel %vm1047_vm2, %v2423_v60, -inf }
 0x7d3   : > { %2571 = vmax.xlane.f32.xlu1 %v2570_v0  ;;  %v2472_v3 = vpop.f32.mrb[74].mxu1  ;;  %2568 = vmax.xlane.f32.xlu0 %v2567_v2  ;;  %v2426_v4 = vpop.f32.mrb[74].mxu0  ;;  %v1692_v62 = vld [vmem:[%s4846_s5 + $0xc] sm:$0xf]  ;;  %v1691_v63 = vld [vmem:[%s4846_s5 + $0x8] sm:$0xf] }
 0x7d4   : > { %v3862_v5 = vpop.f32.mrb[75].mxu0  ;;  %v3868_v6 = vpop.f32.mrb[75].mxu1 }
 0x7d5   : > { %v2949_v5 = vsel %vm1287_vm3, %v1692_v62, 0 }
 0x7d9   : > { %v2515_v8 = vpop.f32.mrb[76].mxu0  ;;  %v2561_v9 = vpop.f32.mrb[76].mxu1 }
 0x7da   : > { %v3873_v10 = vpop.f32.mrb[77].mxu0  ;;  %v3879_v11 = vpop.f32.mrb[77].mxu1  ;;  %v2576_v12 = vsel %vm1047_vm2, %v2561_v9, -inf  ;;  %v2573_v13 = vsel %vm1047_vm2, %v2515_v8, -inf }
 0x7db   : > { %2577 = vmax.xlane.f32.xlu1 %v2576_v12  ;;  %v2564_v14 = vpop.f32.mrb[78].mxu1  ;;  %2574 = vmax.xlane.f32.xlu0 %v2573_v13  ;;  %v2518_v15 = vpop.f32.mrb[78].mxu0  ;;  %v2903_v10 = vsel %vm1287_vm3, %v1691_v63, 0  ;;  %v3448_v63 = vld [vmem:[%s4849_s8 + $0x3] ss:$0 sm:$0xff] }
 0x7dc   : > { %v3874_v16 = vpop.f32.mrb[79].mxu0  ;;  %v3880_v17 = vpop.f32.mrb[79].mxu1 }
 0x860   : > { %v2572_v18 = vpop.xlane.xlu1 %2571  ;;  %v2569_v19 = vpop.xlane.xlu0 %2568 }
 0x861   : > { %v2580_v20 = vsub.f32 %v2469_v61, %v2572_v18  ;;  %v2579_v21 = vsub.f32 %v2423_v60, %v2569_v19  ;;  %v2811_v61 = vsel %vm1287_vm3, %v1689_v56, 0  ;;  %v4041_v56 = vld [vmem:[%s4848_s7 + $0x8] sm:$0xff]  }
 0x863   : > { %v2585_v23 = vmul.f32 1.442695, %v2580_v20  ;;  %v2583_v24 = vmul.f32 1.442695, %v2579_v21 }
 0x865   : > { %4062 = vpow2.f32 %v2585_v23 }
 0x866   : > { %4064 = vpow2.f32 %v2583_v24 }
 0x868   : > { %v2578_v22 = vpop.xlane.xlu1 %2577  ;;  %v2575_v7 = vpop.xlane.xlu0 %2574 }
 0x869   : > { %v2582_v25 = vsub.f32 %v2561_v9, %v2578_v22  ;;  %v2581_v26 = vsub.f32 %v2515_v8, %v2575_v7 }
 0x86b   : > { %v2589_v27 = vmul.f32 1.442695, %v2582_v25  ;;  %v2587_v28 = vmul.f32 1.442695, %v2581_v26 }
 0x86d   : > { %4066 = vpow2.f32 %v2589_v27 }
 0x86e   : > { %4068 = vpow2.f32 %v2587_v28 }
 0x86f   : > { %v4063_v29 = vpop.eup %4062 }
 0x870   : > { %v4065_v30 = vpop.eup %4064  ;;  %v2594_v31 = vsel %vm1047_vm2, %v4063_v29, 0.0 }
 0x871   : > { %2595 = vadd.xlane.f32.xlu1 %v2594_v31  ;;  %v2591_v32 = vsel %vm1047_vm2, %v4065_v30, 0.0 }
 0x872   : > { %2592 = vadd.xlane.f32.xlu0 %v2591_v32 }
 0x877   : > { %v4067_v33 = vpop.eup %4066 }
 0x878   : > { %v4069_v35 = vpop.eup %4068  ;;  %v2600_v36 = vsel %vm1047_vm2, %v4067_v33, 0.0 }
 0x879   : > { %2601 = vadd.xlane.f32.xlu1 %v2600_v36  ;;  %v2597_v37 = vsel %vm1047_vm2, %v4069_v35, 0.0 }
 0x87a   : > { %2598 = vadd.xlane.f32.xlu0 %v2597_v37 }
 0x8fe   : > { %v2596_v38 = vpop.xlane.xlu1 %2595 }
 0x8ff   : > { %4070 = vrcp.f32 %v2596_v38  ;;  %v2593_v39 = vpop.xlane.xlu0 %2592 }
 0x900   : > { %4072 = vrcp.f32 %v2593_v39 }
 0x906   : > { %v2602_v40 = vpop.xlane.xlu1 %2601 }
 0x907   : > { %4074 = vrcp.f32 %v2602_v40  ;;  %v2599_v41 = vpop.xlane.xlu0 %2598 }
 0x908   : > { %4076 = vrcp.f32 %v2599_v41 }
 0x909   : > { %v4071_v42 = vpop.eup %4070 }
 0x90a   : > { %v4073_v43 = vpop.eup %4072  ;;  %v2608_v45 = vmul.f32 %v4071_v42, %v4063_v29 }
 0x90b   : > { %v2607_v47 = vmul.f32 %v4073_v43, %v4065_v30 }
 0x90c   : > { %v2612_v48 = vpack.c.bf16 %v2608_v45, %v2608_v45 }
 0x90d   : > { %v2611_v49 = vpack.c.bf16 %v2607_v47, %v2607_v47 }
 0x90e   : > { %3890 = vmatmul.mubr.msk.bf16.vlgmr.msra.gmra.mrb[80].mxu1 %vm1047_vm2, %v2612_v48 }
 0x90f   : > { %3884 = vmatmul.mubr.msk.bf16.vlgmr.msra.gmra.mrb[80].mxu0 %vm1047_vm2, %v2611_v49  ;;  %3900 = vmatpush3.bf16.msra.mxu1 %v2761_v50 }
 0x910   : > { %3894 = vmatpush3.bf16.msra.mxu0 %v2715_v51  ;;  %3895 = vmatprep.mubr.msk.bf16.mxu0 %vm4147_vm0, %v4146_v1 }
 0x911   : > { %v4075_v53 = vpop.eup %4074  ;;  %3901 = vmatprep.mubr.msk.bf16.mxu1 %vm4147_vm0, %v4146_v1  ;;  %3905 = vmatprep.subr.bf16.mxu0 %v4146_v1 }
 0x912   : > { %v4077_v54 = vpop.eup %4076  ;;  %v2610_v55 = vmul.f32 %v4075_v53, %v4067_v33  ;;  %3911 = vmatprep.subr.bf16.mxu1 %v4146_v1 }
 0x913   : > { %v2609_v57 = vmul.f32 %v4077_v54, %v4069_v35  ;;  %v4038_v54 = vld [vmem:[%s4847_s6] sm:$0xff]  }
 0x914   : > { %v2614_v58 = vpack.c.bf16 %v2610_v55, %v2610_v55  ;;  %v4039_v55 = vld [vmem:[%s4847_s6 + $0x8] sm:$0xff]  }
 0x915   : > { %v2613_v60 = vpack.c.bf16 %v2609_v57, %v2609_v57 }
 0x916   : > { %3902 = vmatmul.mubr.msk.bf16.vlgmr.msra.gmra.mrb[84].mxu1 %vm1047_vm2, %v2614_v58 }
 0x917   : > { %3896 = vmatmul.mubr.msk.bf16.vlgmr.msra.gmra.mrb[84].mxu0 %vm1047_vm2, %v2613_v60  ;;  %3912 = vmatpush3.bf16.msra.mxu1 %v2857_v59 }
 0x918   : > { %3906 = vmatpush3.bf16.msra.mxu0 %v2811_v61  ;;  %3907 = vmatprep.mubr.msk.bf16.mxu0 %vm4147_vm0, %v4146_v1  ;;  %v3447_v61 = vld [vmem:[%s4849_s8 + $0x2] ss:$0 sm:$0xff] }
 0x919   : > { %3913 = vmatprep.mubr.msk.bf16.mxu1 %vm4147_vm0, %v4146_v1  ;;  %3917 = vmatprep.subr.bf16.mxu0 %v4146_v1 }
 0x91a   : > { %3923 = vmatprep.subr.bf16.mxu1 %v4146_v1 }
 0x9e1   : > { %v2705_v0 = vpop.f32.mrb[80].mxu1 }
 0x9e2   : > { %v2659_v2 = vpop.f32.mrb[80].mxu0  ;;  %v2804_v3 = vpack.c.bf16 %v2705_v0, %v2705_v0  ;;  %v3891_v4 = vpop.f32.mrb[81].mxu1 }
 0x9e3   : > { %v2803_v6 = vpack.c.bf16 %v2659_v2, %v2659_v2  ;;  %v3885_v8 = vpop.f32.mrb[81].mxu0  ;;  %v2708_v9 = vpop.f32.mrb[82].mxu1  ;;  %v4042_v4 = vld [vmem:[%s4848_s7 + $0x10] sm:$0xff]  }
 0x9e4   : > { %v2662_v11 = vpop.f32.mrb[82].mxu0  ;;  %v3892_v12 = vpop.f32.mrb[83].mxu1  ;;  %3914 = vmatmul.mubr.msk.bf16.vlgmr.msra.gmra.mrb[88].mxu1 %vm1047_vm2, %v2804_v3 }
 0x9e5   : > { %v3886_v13 = vpop.f32.mrb[83].mxu0  ;;  %3908 = vmatmul.mubr.msk.bf16.vlgmr.msra.gmra.mrb[88].mxu0 %vm1047_vm2, %v2803_v6  ;;  %3924 = vmatpush3.bf16.msra.mxu1 %v2949_v5  ;;  %v4043_v5 = vld [vmem:[%s4848_s7 + $0x18] sm:$0xff]   ;;  %v3449_v6 = vld [vmem:[%s4849_s8 + $0x7] ss:$0 sm:$0xff] }
 0x9e6   : > { %3918 = vmatpush3.bf16.msra.mxu0 %v2903_v10  ;;  %3919 = vmatprep.mubr.msk.bf16.mxu0 %vm4147_vm0, %v4146_v1 }
 0x9e7   : > { %3925 = vmatprep.mubr.msk.bf16.mxu1 %vm4147_vm0, %v4146_v1  ;;  %3929 = vmatprep.subr.bf16.mxu0 %v4146_v1 }
 0x9e8   : > { %3937 = vmatprep.subr.bf16.mxu1 %v4146_v1 }
 0x9e9   : > { %v2797_v14 = vpop.f32.mrb[84].mxu1 }
 0x9ea   : > { %v2751_v15 = vpop.f32.mrb[84].mxu0  ;;  %v2806_v16 = vpack.c.bf16 %v2797_v14, %v2797_v14  ;;  %v3903_v17 = vpop.f32.mrb[85].mxu1 }
 0x9eb   : > { %v2805_v18 = vpack.c.bf16 %v2751_v15, %v2751_v15  ;;  %v3897_v19 = vpop.f32.mrb[85].mxu0  ;;  %v2800_v20 = vpop.f32.mrb[86].mxu1 }
 0x9ec   : > { %v2754_v21 = vpop.f32.mrb[86].mxu0  ;;  %v3904_v23 = vpop.f32.mrb[87].mxu1  ;;  %3926 = vmatmul.mubr.msk.bf16.vlgmr.msra.gmra.mrb[92].mxu1 %vm1047_vm2, %v2806_v16 }
 0x9ed   : > { %v3898_v24 = vpop.f32.mrb[87].mxu0  ;;  %3920 = vmatmul.mubr.msk.bf16.vlgmr.msra.gmra.mrb[92].mxu0 %vm1047_vm2, %v2805_v18  ;;  %3945 = vmatprep.mubr.msk.bf16.mxu1 %vm4147_vm0, %v4146_v1 }
 0x9ee   : > { %3933 = vmatprep.mubr.msk.bf16.mxu0 %vm4147_vm0, %v4146_v1  ;;  %3930 = vmatpush3.bf16.msra.mxu0 %v4038_v54 }
 0x9ef   : > { %3931 = vmatprep.subr.bf16.mxu0 %v4146_v1 }
 0x9f2   : > { %3932 = vmatpush3.bf16.msra.mxu0 %v4039_v55 }
 0xab7   : > { %v2893_v22 = vpop.f32.mrb[88].mxu1 }
 0xab8   : > { %v2847_v7 = vpop.f32.mrb[88].mxu0  ;;  %v2992_v25 = vsel %vm389_vm1, %v2893_v22, 0.0  ;;  %v3915_v26 = vpop.f32.mrb[89].mxu1 }
 0xab9   : > { %v2991_v27 = vsel %vm389_vm1, %v2847_v7, 0.0  ;;  %v3909_v28 = vpop.f32.mrb[89].mxu0  ;;  %v2896_v29 = vpop.f32.mrb[90].mxu1 }
 0xaba   : > { %v2993_v30 = vadd.f32 %v2992_v25, %v2991_v27  ;;  %v2850_v31 = vpop.f32.mrb[90].mxu0  ;;  %v3916_v32 = vpop.f32.mrb[91].mxu1 }
 0xabb   : > { %v3910_v33 = vpop.f32.mrb[91].mxu0  ;;  %v3460_v32 = vld [vmem:[%s4849_s8 + $0x5] ss:$0 sm:$0xff] }
 0xabf   : > { %v2985_v35 = vpop.f32.mrb[92].mxu1 }
 0xac0   : > { %v2939_v36 = vpop.f32.mrb[92].mxu0  ;;  %v3927_v37 = vpop.f32.mrb[93].mxu1  ;;  %v2996_v44 = vsel %vm389_vm1, %v2985_v35, 0.0 }
 0xac1   : > { %v2994_v38 = vsel %vm389_vm1, %v2939_v36, 0.0  ;;  %v3921_v39 = vpop.f32.mrb[93].mxu0  ;;  %v2988_v40 = vpop.f32.mrb[94].mxu1 }
 0xac2   : > { %v2995_v41 = vadd.f32 %v2994_v38, %v2993_v30  ;;  %v2942_v42 = vpop.f32.mrb[94].mxu0  ;;  %v3928_v43 = vpop.f32.mrb[95].mxu1  ;;  %v3459_v30 = vld [vmem:[%s4849_s8 + $0x4] ss:$0 sm:$0xff] }
 0xac3   : > { %v3922_v45 = vpop.f32.mrb[95].mxu0 }
 0xac4   : > { %v2997_v46 = vadd.f32 %v2996_v44, %v2995_v41 }
 0xac6   : > { %v2998_v47 = vadd.f32 %v2997_v46, %v4530_v34  ;;  %v4040_v34 = vld [vmem:[%s4848_s7] sm:$0xff]  }
 0xac7   : > { %3938 = vmatpush3.bf16.msra.mxu1 %v4040_v34 }
 0xac8   : > { %v2999_v48 = vsel %vm389_vm1, %v2998_v47, 0.0  ;;  %3939 = vmatprep.subr.bf16.mxu1 %v4146_v1 }
 0xac9   : > { %3000 = vadd.xlane.f32.xlu0 %v2999_v48 }
 0xacb   : > { %3940 = vmatpush3.bf16.msra.mxu1 %v4041_v56 }
 0xacc   : > { %3941 = vmatprep.subr.bf16.mxu1 %v4146_v1 }
 0xacf   : > { %3942 = vmatpush3.bf16.msra.mxu1 %v4042_v4 }
 0xad0   : > { %3943 = vmatprep.subr.bf16.mxu1 %v4146_v1  ;;  %v3453_v1 = vld [vmem:[%s4849_s8 + $0x6] ss:$0 sm:$0xff] }
 0xad3   : > { %3944 = vmatpush3.bf16.msra.mxu1 %v4043_v5 }
 0xb56   : > { %v3001_v49 = vpop.xlane.xlu0 %3000 }
 0xb57   : > { %v3002_v50 = vmul.f32 0.03125, %v3001_v49 }
 0xb59   : > { %v3003_v51 = vsub.f32 %v2998_v47, %v3002_v50 }
 0xb5b   : > { %v3004_v53 = vmul.f32 %v3003_v51, %v3003_v51 }
 0xb5d   : > { %v3005_v52 = vsel %vm389_vm1, %v3004_v53, 0.0 }
 0xb5e   : > { %3006 = vadd.xlane.f32.xlu1 %v3005_v52 }
 0xbeb   : > { %v3007_v57 = vpop.xlane.xlu1 %3006 }
 0xbec   : > { %v3008_v58 = vmul.f32 0.03125, %v3007_v57 }
 0xbee   : > { %v3009_v59 = vadd.f32 1e-05, %v3008_v58 }
 0xbf0   : > { %4078 = vrsqrt.f32 %v3009_v59 }
 0xbfa   : > { %v4079_v60 = vpop.eup %4078 }
 0xbfb   : > { %v3011_v62 = vmul.f32 %v4079_v60, %v3003_v51 }
 0xbfd   : > { %v3016_v0 = vmul.f32 %v3447_v61, %v3011_v62 }
 0xbff   : > { %v3021_v2 = vadd.f32 %v3448_v63, %v3016_v0 }
 0xc01   : > { %v3022_v3 = vpack.c.bf16 %v3021_v2, %v3021_v2 }
 0xc03   : > { %3934 = vmatmul.mubr.msk.bf16.vlgmr.msra.gmra.mrb[96].mxu0 %vm389_vm1, %v3022_v3 }
 0xcd6   : > { %v3080_v8 = vpop.f32.mrb[96].mxu0 }
 0xcd7   : > { %v3081_v9 = vadd.f32 %v3449_v6, %v3080_v8  ;;  %v3935_v10 = vpop.f32.mrb[97].mxu0 }
 0xcd8   : > { %v3083_v11 = vpop.f32.mrb[98].mxu0 }
 0xcd9   : > { %v3086_v12 = vmax.f32 %v3081_v9, 0.0  ;;  %v3936_v13 = vpop.f32.mrb[99].mxu0 }
 0xcdb   : > { %v3087_v14 = vpack.c.bf16 %v3086_v12, %v3086_v12 }
 0xcdd   : > { %3946 = vmatmul.mubr.msk.bf16.vlgmr.msra.gmra.mrb[96].mxu1 %vm3124_vm4, %v3087_v14 }
 0xdb0   : > { %v3162_v15 = vpop.f32.mrb[96].mxu1 }
 0xdb1   : > { %v3163_v16 = vadd.f32 %v3453_v1, %v3162_v15  ;;  %v3947_v17 = vpop.f32.mrb[97].mxu1 }
 0xdb2   : > { %v3165_v18 = vpop.f32.mrb[98].mxu1 }
 0xdb3   : > { %v3948_v19 = vpop.f32.mrb[99].mxu1  ;;  %v3168_v20 = vadd.f32 %v3163_v16, %v3021_v2 }
 0xdb5   : > { %v3169_v21 = vsel %vm389_vm1, %v3168_v20, 0.0 }
 0xdb6   : > { %3170 = vadd.xlane.f32.xlu0 %v3169_v21 }
 0xe43   : > { %v3171_v23 = vpop.xlane.xlu0 %3170 }
 0xe44   : > { %v3172_v24 = vmul.f32 0.03125, %v3171_v23 }
 0xe46   : > { %v3173_v22 = vsub.f32 %v3168_v20, %v3172_v24 }
 0xe48   : > { %v3174_v7 = vmul.f32 %v3173_v22, %v3173_v22 }
 0xe4a   : > { %v3175_v25 = vsel %vm389_vm1, %v3174_v7, 0.0 }
 0xe4b   : > { %3176 = vadd.xlane.f32.xlu1 %v3175_v25 }
 0xed8   : > { %v3177_v26 = vpop.xlane.xlu1 %3176 }
 0xed9   : > { %v3178_v27 = vmul.f32 0.03125, %v3177_v26 }
 0xedb   : > { %v3179_v28 = vadd.f32 1e-05, %v3178_v27 }
 0xedd   : > { %4080 = vrsqrt.f32 %v3179_v28 }
 0xee7   : > { %v4081_v29 = vpop.eup %4080 }
 0xee8   : > { %v3181_v31 = vmul.f32 %v4081_v29, %v3173_v22 }
 0xeea   : > { %v3186_v33 = vmul.f32 %v3459_v30, %v3181_v31 }
 0xeec   : > { %v3191_v35 = vadd.f32 %v3460_v32, %v3186_v33 }
 0xeee   : > { %3192 = vst.msk [vmem:[%s336_s17] sm:$0xff] %vm389_vm1, %v3191_v35 }
 0xeef   : > { %4095 = shalt.err (!%p4092_p3)
}
 0xef0   : > { %s4096_s23 = scalar_lea.hbm %s4798_s22, 128  ;;  %s4100_s17 = scalar_lea.hbm %s4850_s9, 256 }
 0xef1   : > { %p4097_p4 = scmp.ne.s32.totalorder %s4798_s22, %s4096_s23  ;;  %p4101_p9 = scmp.lt.u32.totalorder %s4798_s22, %s4850_s9 }
 0xef2   : > { %p4102_p10 = scmp.lt.u32.totalorder %s4100_s17, %s4096_s23  ;;  %p4104_p12 = scmp.lt.u32.totalorder %s4096_s23, %s4798_s22 }
 0xef3   : > { %p4098_p7 = pnand %p4097_p4, %p4237_p5 }
 0xef4   : > { %p4103_p11 = por %p4102_p10, %p4101_p9 }
 0xef5   : > { %p4099_p8 = pneg %p4098_p7 }
 0xef6   : > { %p4105_p13 = por %p4104_p12, %p4103_p11 }
 0xef8   : > { %p4106_p0 = pnand %p4105_p13, %p4099_p8 }
 0xefa   : > { %4109 = shalt.err (!%p4106_p0)
}
 0xefb   : > { %3949 = dma.vmem_to_hbm [thread:$0]  (%p4237_p5), %s4800_s29, 128, %s4798_s22, %s3194_s25  }
 0xefc PF: > { %p3955_p1 = scmp.ge.s32.totalorder %s4144_s12, 2  ;;  %s3219_s26 = sand.u32 1, %s4132_s30  }
 0xefd   : > { %s3220_s13 = scalar_lea.sflag [#allocation3], %s3219_s26 }
 0xefe   : > { %p3952_p2 = pnand %p3955_p1, %p4241_p6 }
 0xf00   : > { %4127 = dma.done.wait (!%p3952_p2), %s3220_s13, 128  }
 0xf01   : > { %4129 = vsyncadd (!%p3952_p2), %s3220_s13, 4294967168  ;;  %p19_p3 = scmp.ge.s32.totalorder %s4224_s15, 4   ;;  %s4853_s30 = smov %s4136_s10 }
 0xf02   : > { %s4854_s10 = smov %s4140_s11  ;;  %s4855_s11 = smov %s4235_s18 }
 0xf03   : > { %s4856_s12 = smov %s4224_s15  ;;  %21 = sbr.rel (!%p19_p3) target bundleno = 3 (0x3), region = 98 }
 0xf0a   :  { %3225 = vsyncpa [#allocation3], 1 }
 0xf0b   :  { %3227 = vsyncpa [#allocation3 + $0x1], 1 }

</bundles_post_ra>
